<compile_context>
chip_gen: v7x
topology: tpu7x:2x2x1
jax: 0.10.0
libtpu: 0.0.40
codegen_flags: <defaults>
</compile_context>

<pallas_src>
import jax
import jax.numpy as jnp
from jax.experimental import pallas as pl
from jax.experimental.pallas import tpu as pltpu

SELU_ALPHA = 1.6732632423543772
SELU_SCALE = 1.0507009873554805
LOG_2PI = 1.8378770664093453
OUT_WIDTH = 128          # lane-dense output slab width (>= action_dim + 1)
DEFAULT_TILE_B = 2048    # batch tile (256-aligned); ~6-7 MiB VMEM footprint in f32
MIN_SPLIT_ROWS = 512     # split a single-tile batch >= this so v7x's 2 TCs both get work


def _round_up(x, m):
    return ((x + m - 1) // m) * m


def _selu(x):
    # exp only on the (clamped) negative branch: the discarded positive branch can't overflow.
    return SELU_SCALE * jnp.where(x > 0, x, SELU_ALPHA * (jnp.exp(jnp.minimum(x, 0.0)) - 1.0))


# ---------------------------------------------------------------------------
# Fused kernel: one batch tile -> (TB, 128) output slab [mean | value | zeros]
# ---------------------------------------------------------------------------
def _fused_kernel(obs_ref,
                  w0_ref, b0_ref, w1_ref, b1_ref, w2_ref, b2_ref,   # fused block-diag trunk
                  hw_ref, hb_ref,                                   # fused heads
                  out_ref):
    cdt = w0_ref.dtype   # compute dtype of the MXU inputs (f32 by default, bf16 if relaxed)
    x = obs_ref[...].astype(cdt)
    h = _selu(jnp.dot(x, w0_ref[...], preferred_element_type=jnp.float32) + b0_ref[...])
    h = _selu(jnp.dot(h.astype(cdt), w1_ref[...], preferred_element_type=jnp.float32) + b1_ref[...])
    h = _selu(jnp.dot(h.astype(cdt), w2_ref[...], preferred_element_type=jnp.float32) + b2_ref[...])
    out_ref[...] = (jnp.dot(h.astype(cdt), hw_ref[...], preferred_element_type=jnp.float32)
                    + hb_ref[...]).astype(out_ref.dtype)


# ---------------------------------------------------------------------------
# Parameter fusion (done once, outside the kernel)
# ---------------------------------------------------------------------------
def fuse_params(p, dtype=jnp.float32):
    """Build block-diagonal fused weights from separate actor/critic params.

    dtype: keep jnp.float32 for 1e-4 accuracy; jnp.bfloat16 only if the accuracy budget
    is relaxed to ~1e-2 (bf16 MXU is the largest pure-compute lever, esp. on v5e).
    """
    H = p["aw0"].shape[1]                 # hidden width per trunk
    A = p["head_w"].shape[1]              # action dim
    assert A + 1 <= OUT_WIDTH

    def blockdiag(a, c):
        top = jnp.concatenate([a, jnp.zeros((H, H), jnp.float32)], axis=1)
        bot = jnp.concatenate([jnp.zeros((H, H), jnp.float32), c], axis=1)
        return jnp.concatenate([top, bot], axis=0)                  # (2H, 2H)

    w0 = jnp.concatenate([p["aw0"], p["cw0"]], axis=1)              # (obs_dim, 2H)
    b0 = jnp.concatenate([p["ab0"], p["cb0"]], axis=1)              # (1, 2H)
    w1 = blockdiag(p["aw1"], p["cw1"])
    b1 = jnp.concatenate([p["ab1"], p["cb1"]], axis=1)
    w2 = blockdiag(p["aw2"], p["cw2"])
    b2 = jnp.concatenate([p["ab2"], p["cb2"]], axis=1)

    # Fused head: (2H, OUT_WIDTH). Cols [0:A) <- actor mean head, col A <- critic value head.
    hw = jnp.zeros((2 * H, OUT_WIDTH), jnp.float32)
    hw = hw.at[:H, :A].set(p["head_w"])
    hw = hw.at[H:, A:A + 1].set(p["cw3"])
    hb = jnp.zeros((1, OUT_WIDTH), jnp.float32)
    hb = hb.at[:, :A].set(p["head_b"])
    hb = hb.at[:, A:A + 1].set(p["cb3"])

    # Deterministic diag-Gaussian log prob of the mean: constant per batch row.
    logp_const = jnp.sum(-p["log_std"]) - 0.5 * A * LOG_2PI

    cast = lambda a: a.astype(dtype)
    return {"w0": cast(w0), "b0": cast(b0), "w1": cast(w1), "b1": cast(b1),
            "w2": cast(w2), "b2": cast(b2), "hw": cast(hw), "hb": cast(hb),
            "action_dim": A, "logp_const": logp_const}


# ---------------------------------------------------------------------------
# Batch-tile selection
# ---------------------------------------------------------------------------
def _choose_tile_b(B, tile_b):
    """Return (TB, B_pad). B_pad is only padded to a sublane multiple (8), NOT a full tile."""
    B_pad = _round_up(B, 8)
    tile_b = max(8, _round_up(tile_b, 8))
    if B_pad > tile_b:
        TB = tile_b                                   # ragged last block handled by Pallas
    elif B_pad >= MIN_SPLIT_ROWS:
        # Fits in one tile but big enough to split in two 256-aligned blocks so both v7x
        # TensorCores get work (the "parallel" batch axis shards grid steps across TCs).
        TB = _round_up(pl.cdiv(B_pad, 2), 256)
    else:
        TB = B_pad                                    # single small tile, block == array
    return TB, B_pad


# ---------------------------------------------------------------------------
# Wrapper
# ---------------------------------------------------------------------------
def actor_critic_act(obs, fused, *, tile_b=DEFAULT_TILE_B):
    """Fused actor+critic forward. Returns (actions, action_log_probs, value)."""
    B, obs_dim = obs.shape
    A = fused["action_dim"]

    TB, B_pad = _choose_tile_b(B, tile_b)
    if B_pad != B:
        obs = jnp.pad(obs, ((0, B_pad - B), (0, 0)))
    n_blocks = pl.cdiv(B_pad, TB)

    weights = [fused["w0"], fused["b0"], fused["w1"], fused["b1"],
               fused["w2"], fused["b2"], fused["hw"], fused["hb"]]

    def call(weight_pipeline_mode):
        in_specs = [pl.BlockSpec((TB, obs_dim), lambda i: (i, 0))]   # streamed per batch tile
        in_specs += [pl.BlockSpec(w.shape, lambda i: (0, 0),
                                  pipeline_mode=weight_pipeline_mode)
                     for w in weights]                               # VMEM-resident weights
        return pl.pallas_call(
            _fused_kernel,
            grid=(n_blocks,),
            in_specs=in_specs,
            out_specs=pl.BlockSpec((TB, OUT_WIDTH), lambda i: (i, 0)),
            out_shape=jax.ShapeDtypeStruct((B_pad, OUT_WIDTH), jnp.float32),
            compiler_params=pltpu.CompilerParams(
                dimension_semantics=("parallel",),   # batch blocks independent -> megacore/v7x
                vmem_limit_bytes=32 << 20,           # headroom for large TB, safe on v7x (64 MiB)
            ),
        )(obs, *weights)

    try:
        # Constant index_map -> weights fetched once; single-buffer them to save ~0.7 MiB VMEM.
        out = call(pl.Buffered(1))
    except Exception:
        # TODO(synk): fallback to default double-buffered weights if this jax build rejects
        # per-operand pipeline_mode (only costs ~0.7 MiB of VMEM headroom).
        out = call(None)

    actions = out[:B, :A]
    value = out[:B, A:A + 1]
    log_probs = jnp.full((B, 1), fused["logp_const"], jnp.float32)
    return actions, log_probs, value


# ---------------------------------------------------------------------------
# Parameter construction (weights stored [in, out]; PyTorch nn.Linear is [out, in])
# ---------------------------------------------------------------------------
def _orthogonal(key, shape, gain):
    rows, cols = shape
    n = max(rows, cols)
    a = jax.random.normal(key, (n, n), dtype=jnp.float32)
    q, r = jnp.linalg.qr(a)
    q = q * jnp.sign(jnp.diagonal(r))
    return gain * q[:rows, :cols]


def make_params(key, obs_dim, action_dim, hidden=(128, 128, 128)):
    ks = jax.random.split(key, 16)
    sqrt2 = jnp.sqrt(2.0).astype(jnp.float32)
    p = {}
    dims = (obs_dim,) + tuple(hidden)
    for l in range(3):
        p[f"aw{l}"] = _orthogonal(ks[l], (dims[l], dims[l + 1]), sqrt2)
        p[f"ab{l}"] = jnp.zeros((1, dims[l + 1]), jnp.float32)
    p["head_w"] = _orthogonal(ks[3], (hidden[-1], action_dim), 0.01)
    p["head_b"] = jnp.zeros((1, action_dim), jnp.float32)
    p["log_std"] = jnp.zeros((1, action_dim), jnp.float32)
    for l in range(3):
        p[f"cw{l}"] = _orthogonal(ks[4 + l], (dims[l], dims[l + 1]), sqrt2)
        p[f"cb{l}"] = jnp.zeros((1, dims[l + 1]), jnp.float32)
    p["cw3"] = _orthogonal(ks[7], (hidden[-1], 1), 1.0)
    p["cb3"] = jnp.zeros((1, 1), jnp.float32)
    return p


# ---------------------------------------------------------------------------
# Pure-JAX reference (un-fused params)
# ---------------------------------------------------------------------------
def _reference_act(obs, p):
    h = obs
    for l in range(3):
        h = jax.nn.selu(h @ p[f"aw{l}"] + p[f"ab{l}"])
    mean = h @ p["head_w"] + p["head_b"]
    logp = jnp.sum(-p["log_std"] - 0.5 * LOG_2PI, axis=-1, keepdims=True)
    logp = jnp.broadcast_to(logp, (obs.shape[0], 1))
    c = obs
    for l in range(3):
        c = jax.nn.selu(c @ p[f"cw{l}"] + p[f"cb{l}"])
    value = c @ p["cw3"] + p["cb3"]
    return mean, logp, value


if __name__ == "__main__":
    key = jax.random.PRNGKey(0)
    k_obs, k_obs2, k_params = jax.random.split(key, 3)

    OBS_DIM, ACT_DIM = 32, 4
    params = make_params(k_params, OBS_DIM, ACT_DIM)
    fused = fuse_params(params)

    # Small-batch check (single tile, block == full array).
    B = 8
    obs = jax.random.normal(k_obs, (B, OBS_DIM), dtype=jnp.float32)
    actions, log_probs, value = jax.block_until_ready(actor_critic_act(obs, fused))
    ref_a, ref_lp, ref_v = _reference_act(obs, params)
    assert actions.shape == (B, ACT_DIM) and log_probs.shape == (B, 1) and value.shape == (B, 1)
    assert jnp.allclose(actions, ref_a, atol=1e-4, rtol=1e-4)
    assert jnp.allclose(log_probs, ref_lp, atol=1e-5, rtol=1e-5)
    assert jnp.allclose(value, ref_v, atol=1e-4, rtol=1e-4)

    # Multi-tile + ragged-edge check: B=600, tile_b=256 -> grid=3, last block 88 valid rows.
    B2 = 600
    obs2 = jax.random.normal(k_obs2, (B2, OBS_DIM), dtype=jnp.float32)
    a2, lp2, v2 = jax.block_until_ready(actor_critic_act(obs2, fused, tile_b=256))
    ra2, rlp2, rv2 = _reference_act(obs2, params)
    assert a2.shape == (B2, ACT_DIM) and lp2.shape == (B2, 1) and v2.shape == (B2, 1)
    assert jnp.allclose(a2, ra2, atol=1e-4, rtol=1e-4)
    assert jnp.allclose(lp2, rlp2, atol=1e-5, rtol=1e-5)
    assert jnp.allclose(v2, rv2, atol=1e-4, rtol=1e-4)

    # Default-tile path: batch fits in one tile but >= 512 rows -> split into two 512-row
    # blocks (grid=2, ragged last block) so both v7x TensorCores would get work.
    a3, lp3, v3 = jax.block_until_ready(actor_critic_act(obs2, fused))
    assert jnp.allclose(a3, ra2, atol=1e-4, rtol=1e-4)
    assert jnp.allclose(lp3, rlp2, atol=1e-5, rtol=1e-5)
    assert jnp.allclose(v3, rv2, atol=1e-4, rtol=1e-4)

    print("KERNEL_OK")
</pallas_src>

<mosaic_0001>
module attributes {stable_mosaic.version = 11 : i64} {
  func.func @_fused_kernel(%arg0: i32, %arg1: memref<8x32xf32, #tpu.memory_space<vmem>>, %arg2: memref<32x256xf32, #tpu.memory_space<vmem>>, %arg3: memref<1x256xf32, #tpu.memory_space<vmem>>, %arg4: memref<256x256xf32, #tpu.memory_space<vmem>>, %arg5: memref<1x256xf32, #tpu.memory_space<vmem>>, %arg6: memref<256x256xf32, #tpu.memory_space<vmem>>, %arg7: memref<1x256xf32, #tpu.memory_space<vmem>>, %arg8: memref<256x128xf32, #tpu.memory_space<vmem>>, %arg9: memref<1x128xf32, #tpu.memory_space<vmem>>, %arg10: memref<8x128xf32, #tpu.memory_space<vmem>>) attributes {dimension_semantics = [#tpu.dimension_semantics<parallel>], iteration_bounds = array<i64: 1>, scalar_prefetch = 0 : i64, scratch_operands = 0 : i64, tpu.core_type = #tpu.core_type<tc>, window_params = [{transform_indices = @transform_0, window_bounds = array<i64: 8, 32>}, {pipeline_mode = #tpu.pipeline_mode<synchronous>, transform_indices = @transform_1, window_bounds = array<i64: 32, 256>}, {pipeline_mode = #tpu.pipeline_mode<synchronous>, transform_indices = @transform_2, window_bounds = array<i64: 1, 256>}, {pipeline_mode = #tpu.pipeline_mode<synchronous>, transform_indices = @transform_3, window_bounds = array<i64: 256, 256>}, {pipeline_mode = #tpu.pipeline_mode<synchronous>, transform_indices = @transform_4, window_bounds = array<i64: 1, 256>}, {pipeline_mode = #tpu.pipeline_mode<synchronous>, transform_indices = @transform_5, window_bounds = array<i64: 256, 256>}, {pipeline_mode = #tpu.pipeline_mode<synchronous>, transform_indices = @transform_6, window_bounds = array<i64: 1, 256>}, {pipeline_mode = #tpu.pipeline_mode<synchronous>, transform_indices = @transform_7, window_bounds = array<i64: 256, 128>}, {pipeline_mode = #tpu.pipeline_mode<synchronous>, transform_indices = @transform_8, window_bounds = array<i64: 1, 128>}, {transform_indices = @transform_9, window_bounds = array<i64: 8, 128>}]} {
    %c0 = arith.constant 0 : index
    %c0_0 = arith.constant 0 : index
    %0 = vector.load %arg1[%c0, %c0_0] : memref<8x32xf32, #tpu.memory_space<vmem>>, vector<8x32xf32>
    %c0_1 = arith.constant 0 : index
    %c0_2 = arith.constant 0 : index
    %1 = vector.load %arg2[%c0_1, %c0_2] : memref<32x256xf32, #tpu.memory_space<vmem>>, vector<32x256xf32>
    %cst = arith.constant dense<0.000000e+00> : vector<8x256xf32>
    %2 = tpu.matmul %0, %1, %cst {dimension_numbers = #tpu.dot_dimension_numbers<[1], [0], [0], [1], [0, 0, 1, 1], [], []>} : vector<8x32xf32>, vector<32x256xf32>, vector<8x256xf32> -> vector<8x256xf32>
    %c0_3 = arith.constant 0 : index
    %c0_4 = arith.constant 0 : index
    %3 = vector.load %arg3[%c0_3, %c0_4] : memref<1x256xf32, #tpu.memory_space<vmem>>, vector<1x256xf32>
    %4 = vector.broadcast %3 : vector<1x256xf32> to vector<8x256xf32>
    %5 = arith.addf %2, %4 : vector<8x256xf32>
    %cst_5 = arith.constant 0.000000e+00 : f32
    %6 = vector.broadcast %cst_5 : f32 to vector<8x256xf32>
    %7 = arith.cmpf ogt, %5, %6 : vector<8x256xf32>
    %cst_6 = arith.constant 0.000000e+00 : f32
    %8 = vector.broadcast %cst_6 : f32 to vector<8x256xf32>
    %9 = arith.minimumf %5, %8 : vector<8x256xf32>
    %10 = math.exp %9 : vector<8x256xf32>
    %cst_7 = arith.constant 1.000000e+00 : f32
    %11 = vector.broadcast %cst_7 : f32 to vector<8x256xf32>
    %12 = arith.subf %10, %11 : vector<8x256xf32>
    %cst_8 = arith.constant 1.67326319 : f32
    %13 = vector.broadcast %cst_8 : f32 to vector<8x256xf32>
    %14 = arith.mulf %13, %12 : vector<8x256xf32>
    %15 = arith.select %7, %5, %14 : vector<8x256xi1>, vector<8x256xf32>
    %cst_9 = arith.constant 1.05070102 : f32
    %16 = vector.broadcast %cst_9 : f32 to vector<8x256xf32>
    %17 = arith.mulf %16, %15 : vector<8x256xf32>
    %c0_10 = arith.constant 0 : index
    %c0_11 = arith.constant 0 : index
    %18 = vector.load %arg4[%c0_10, %c0_11] : memref<256x256xf32, #tpu.memory_space<vmem>>, vector<256x256xf32>
    %cst_12 = arith.constant dense<0.000000e+00> : vector<8x256xf32>
    %19 = tpu.matmul %17, %18, %cst_12 {dimension_numbers = #tpu.dot_dimension_numbers<[1], [0], [0], [1], [0, 0, 1, 1], [], []>} : vector<8x256xf32>, vector<256x256xf32>, vector<8x256xf32> -> vector<8x256xf32>
    %c0_13 = arith.constant 0 : index
    %c0_14 = arith.constant 0 : index
    %20 = vector.load %arg5[%c0_13, %c0_14] : memref<1x256xf32, #tpu.memory_space<vmem>>, vector<1x256xf32>
    %21 = vector.broadcast %20 : vector<1x256xf32> to vector<8x256xf32>
    %22 = arith.addf %19, %21 : vector<8x256xf32>
    %cst_15 = arith.constant 0.000000e+00 : f32
    %23 = vector.broadcast %cst_15 : f32 to vector<8x256xf32>
    %24 = arith.cmpf ogt, %22, %23 : vector<8x256xf32>
    %cst_16 = arith.constant 0.000000e+00 : f32
    %25 = vector.broadcast %cst_16 : f32 to vector<8x256xf32>
    %26 = arith.minimumf %22, %25 : vector<8x256xf32>
    %27 = math.exp %26 : vector<8x256xf32>
    %cst_17 = arith.constant 1.000000e+00 : f32
    %28 = vector.broadcast %cst_17 : f32 to vector<8x256xf32>
    %29 = arith.subf %27, %28 : vector<8x256xf32>
    %cst_18 = arith.constant 1.67326319 : f32
    %30 = vector.broadcast %cst_18 : f32 to vector<8x256xf32>
    %31 = arith.mulf %30, %29 : vector<8x256xf32>
    %32 = arith.select %24, %22, %31 : vector<8x256xi1>, vector<8x256xf32>
    %cst_19 = arith.constant 1.05070102 : f32
    %33 = vector.broadcast %cst_19 : f32 to vector<8x256xf32>
    %34 = arith.mulf %33, %32 : vector<8x256xf32>
    %c0_20 = arith.constant 0 : index
    %c0_21 = arith.constant 0 : index
    %35 = vector.load %arg6[%c0_20, %c0_21] : memref<256x256xf32, #tpu.memory_space<vmem>>, vector<256x256xf32>
    %cst_22 = arith.constant dense<0.000000e+00> : vector<8x256xf32>
    %36 = tpu.matmul %34, %35, %cst_22 {dimension_numbers = #tpu.dot_dimension_numbers<[1], [0], [0], [1], [0, 0, 1, 1], [], []>} : vector<8x256xf32>, vector<256x256xf32>, vector<8x256xf32> -> vector<8x256xf32>
    %c0_23 = arith.constant 0 : index
    %c0_24 = arith.constant 0 : index
    %37 = vector.load %arg7[%c0_23, %c0_24] : memref<1x256xf32, #tpu.memory_space<vmem>>, vector<1x256xf32>
    %38 = vector.broadcast %37 : vector<1x256xf32> to vector<8x256xf32>
    %39 = arith.addf %36, %38 : vector<8x256xf32>
    %cst_25 = arith.constant 0.000000e+00 : f32
    %40 = vector.broadcast %cst_25 : f32 to vector<8x256xf32>
    %41 = arith.cmpf ogt, %39, %40 : vector<8x256xf32>
    %cst_26 = arith.constant 0.000000e+00 : f32
    %42 = vector.broadcast %cst_26 : f32 to vector<8x256xf32>
    %43 = arith.minimumf %39, %42 : vector<8x256xf32>
    %44 = math.exp %43 : vector<8x256xf32>
    %cst_27 = arith.constant 1.000000e+00 : f32
    %45 = vector.broadcast %cst_27 : f32 to vector<8x256xf32>
    %46 = arith.subf %44, %45 : vector<8x256xf32>
    %cst_28 = arith.constant 1.67326319 : f32
    %47 = vector.broadcast %cst_28 : f32 to vector<8x256xf32>
    %48 = arith.mulf %47, %46 : vector<8x256xf32>
    %49 = arith.select %41, %39, %48 : vector<8x256xi1>, vector<8x256xf32>
    %cst_29 = arith.constant 1.05070102 : f32
    %50 = vector.broadcast %cst_29 : f32 to vector<8x256xf32>
    %51 = arith.mulf %50, %49 : vector<8x256xf32>
    %c0_30 = arith.constant 0 : index
    %c0_31 = arith.constant 0 : index
    %52 = vector.load %arg8[%c0_30, %c0_31] : memref<256x128xf32, #tpu.memory_space<vmem>>, vector<256x128xf32>
    %cst_32 = arith.constant dense<0.000000e+00> : vector<8x128xf32>
    %53 = tpu.matmul %51, %52, %cst_32 {dimension_numbers = #tpu.dot_dimension_numbers<[1], [0], [0], [1], [0, 0, 1, 1], [], []>} : vector<8x256xf32>, vector<256x128xf32>, vector<8x128xf32> -> vector<8x128xf32>
    %c0_33 = arith.constant 0 : index
    %c0_34 = arith.constant 0 : index
    %54 = vector.load %arg9[%c0_33, %c0_34] : memref<1x128xf32, #tpu.memory_space<vmem>>, vector<1x128xf32>
    %55 = vector.broadcast %54 : vector<1x128xf32> to vector<8x128xf32>
    %56 = arith.addf %53, %55 : vector<8x128xf32>
    %c0_35 = arith.constant 0 : index
    %c0_36 = arith.constant 0 : index
    %57 = vector.load %arg10[%c0_35, %c0_36] : memref<8x128xf32, #tpu.memory_space<vmem>>, vector<8x128xf32>
    tpu.vector_store %arg10[%c0_35, %c0_36], %56 {strides = array<i32>} : memref<8x128xf32, #tpu.memory_space<vmem>>, vector<8x128xf32>,
    return
  }
  func.func @transform_0(%arg0: i32) -> (i32, i32) {
    %c0_i32 = arith.constant 0 : i32
    %c0_i32_0 = arith.constant 0 : i32
    return %arg0, %c0_i32 : i32, i32
  }
  func.func @transform_1(%arg0: i32) -> (i32, i32) {
    %c0_i32 = arith.constant 0 : i32
    %c0_i32_0 = arith.constant 0 : i32
    %c0_i32_1 = arith.constant 0 : i32
    return %c0_i32, %c0_i32_0 : i32, i32
  }
  func.func @transform_2(%arg0: i32) -> (i32, i32) {
    %c0_i32 = arith.constant 0 : i32
    %c0_i32_0 = arith.constant 0 : i32
    %c0_i32_1 = arith.constant 0 : i32
    return %c0_i32, %c0_i32_0 : i32, i32
  }
  func.func @transform_3(%arg0: i32) -> (i32, i32) {
    %c0_i32 = arith.constant 0 : i32
    %c0_i32_0 = arith.constant 0 : i32
    %c0_i32_1 = arith.constant 0 : i32
    return %c0_i32, %c0_i32_0 : i32, i32
  }
  func.func @transform_4(%arg0: i32) -> (i32, i32) {
    %c0_i32 = arith.constant 0 : i32
    %c0_i32_0 = arith.constant 0 : i32
    %c0_i32_1 = arith.constant 0 : i32
    return %c0_i32, %c0_i32_0 : i32, i32
  }
  func.func @transform_5(%arg0: i32) -> (i32, i32) {
    %c0_i32 = arith.constant 0 : i32
    %c0_i32_0 = arith.constant 0 : i32
    %c0_i32_1 = arith.constant 0 : i32
    return %c0_i32, %c0_i32_0 : i32, i32
  }
  func.func @transform_6(%arg0: i32) -> (i32, i32) {
    %c0_i32 = arith.constant 0 : i32
    %c0_i32_0 = arith.constant 0 : i32
    %c0_i32_1 = arith.constant 0 : i32
    return %c0_i32, %c0_i32_0 : i32, i32
  }
  func.func @transform_7(%arg0: i32) -> (i32, i32) {
    %c0_i32 = arith.constant 0 : i32
    %c0_i32_0 = arith.constant 0 : i32
    %c0_i32_1 = arith.constant 0 : i32
    return %c0_i32, %c0_i32_0 : i32, i32
  }
  func.func @transform_8(%arg0: i32) -> (i32, i32) {
    %c0_i32 = arith.constant 0 : i32
    %c0_i32_0 = arith.constant 0 : i32
    %c0_i32_1 = arith.constant 0 : i32
    return %c0_i32, %c0_i32_0 : i32, i32
  }
  func.func @transform_9(%arg0: i32) -> (i32, i32) {
    %c0_i32 = arith.constant 0 : i32
    %c0_i32_0 = arith.constant 0 : i32
    return %arg0, %c0_i32 : i32, i32
  }
}

module attributes {stable_mosaic.version = 11 : i64} {
  func.func @_fused_kernel(%arg0: i32, %arg1: memref<8x32xf32, #tpu.memory_space<vmem>>, %arg2: memref<32x256xf32, #tpu.memory_space<vmem>>, %arg3: memref<1x256xf32, #tpu.memory_space<vmem>>, %arg4: memref<256x256xf32, #tpu.memory_space<vmem>>, %arg5: memref<1x256xf32, #tpu.memory_space<vmem>>, %arg6: memref<256x256xf32, #tpu.memory_space<vmem>>, %arg7: memref<1x256xf32, #tpu.memory_space<vmem>>, %arg8: memref<256x128xf32, #tpu.memory_space<vmem>>, %arg9: memref<1x128xf32, #tpu.memory_space<vmem>>, %arg10: memref<8x128xf32, #tpu.memory_space<vmem>>) attributes {dimension_semantics = [#tpu.dimension_semantics<parallel>], iteration_bounds = array<i64: 1>, scalar_prefetch = 0 : i64, scratch_operands = 0 : i64, tpu.core_type = #tpu.core_type<tc>, window_params = [{transform_indices = @transform_0, window_bounds = array<i64: 8, 32>}, {pipeline_mode = #tpu.pipeline_mode<synchronous>, transform_indices = @transform_1, window_bounds = array<i64: 32, 256>}, {pipeline_mode = #tpu.pipeline_mode<synchronous>, transform_indices = @transform_2, window_bounds = array<i64: 1, 256>}, {pipeline_mode = #tpu.pipeline_mode<synchronous>, transform_indices = @transform_3, window_bounds = array<i64: 256, 256>}, {pipeline_mode = #tpu.pipeline_mode<synchronous>, transform_indices = @transform_4, window_bounds = array<i64: 1, 256>}, {pipeline_mode = #tpu.pipeline_mode<synchronous>, transform_indices = @transform_5, window_bounds = array<i64: 256, 256>}, {pipeline_mode = #tpu.pipeline_mode<synchronous>, transform_indices = @transform_6, window_bounds = array<i64: 1, 256>}, {pipeline_mode = #tpu.pipeline_mode<synchronous>, transform_indices = @transform_7, window_bounds = array<i64: 256, 128>}, {pipeline_mode = #tpu.pipeline_mode<synchronous>, transform_indices = @transform_8, window_bounds = array<i64: 1, 128>}, {transform_indices = @transform_9, window_bounds = array<i64: 8, 128>}]} {
    %c0 = arith.constant 0 : index
    %c0_0 = arith.constant 0 : index
    %0 = vector.load %arg1[%c0, %c0_0] : memref<8x32xf32, #tpu.memory_space<vmem>>, vector<8x32xf32>
    %c0_1 = arith.constant 0 : index
    %c0_2 = arith.constant 0 : index
    %1 = vector.load %arg2[%c0_1, %c0_2] : memref<32x256xf32, #tpu.memory_space<vmem>>, vector<32x256xf32>
    %cst = arith.constant dense<0.000000e+00> : vector<8x256xf32>
    %2 = tpu.matmul %0, %1, %cst {dimension_numbers = #tpu.dot_dimension_numbers<[1], [0], [0], [1], [0, 0, 1, 1], [], []>} : vector<8x32xf32>, vector<32x256xf32>, vector<8x256xf32> -> vector<8x256xf32>
    %c0_3 = arith.constant 0 : index
    %c0_4 = arith.constant 0 : index
    %3 = vector.load %arg3[%c0_3, %c0_4] : memref<1x256xf32, #tpu.memory_space<vmem>>, vector<1x256xf32>
    %4 = vector.broadcast %3 : vector<1x256xf32> to vector<8x256xf32>
    %5 = arith.addf %2, %4 : vector<8x256xf32>
    %cst_5 = arith.constant 0.000000e+00 : f32
    %6 = vector.broadcast %cst_5 : f32 to vector<8x256xf32>
    %7 = arith.cmpf ogt, %5, %6 : vector<8x256xf32>
    %cst_6 = arith.constant 0.000000e+00 : f32
    %8 = vector.broadcast %cst_6 : f32 to vector<8x256xf32>
    %9 = arith.minimumf %5, %8 : vector<8x256xf32>
    %10 = math.exp %9 : vector<8x256xf32>
    %cst_7 = arith.constant 1.000000e+00 : f32
    %11 = vector.broadcast %cst_7 : f32 to vector<8x256xf32>
    %12 = arith.subf %10, %11 : vector<8x256xf32>
    %cst_8 = arith.constant 1.67326319 : f32
    %13 = vector.broadcast %cst_8 : f32 to vector<8x256xf32>
    %14 = arith.mulf %13, %12 : vector<8x256xf32>
    %15 = arith.select %7, %5, %14 : vector<8x256xi1>, vector<8x256xf32>
    %cst_9 = arith.constant 1.05070102 : f32
    %16 = vector.broadcast %cst_9 : f32 to vector<8x256xf32>
    %17 = arith.mulf %16, %15 : vector<8x256xf32>
    %c0_10 = arith.constant 0 : index
    %c0_11 = arith.constant 0 : index
    %18 = vector.load %arg4[%c0_10, %c0_11] : memref<256x256xf32, #tpu.memory_space<vmem>>, vector<256x256xf32>
    %cst_12 = arith.constant dense<0.000000e+00> : vector<8x256xf32>
    %19 = tpu.matmul %17, %18, %cst_12 {dimension_numbers = #tpu.dot_dimension_numbers<[1], [0], [0], [1], [0, 0, 1, 1], [], []>} : vector<8x256xf32>, vector<256x256xf32>, vector<8x256xf32> -> vector<8x256xf32>
    %c0_13 = arith.constant 0 : index
    %c0_14 = arith.constant 0 : index
    %20 = vector.load %arg5[%c0_13, %c0_14] : memref<1x256xf32, #tpu.memory_space<vmem>>, vector<1x256xf32>
    %21 = vector.broadcast %20 : vector<1x256xf32> to vector<8x256xf32>
    %22 = arith.addf %19, %21 : vector<8x256xf32>
    %cst_15 = arith.constant 0.000000e+00 : f32
    %23 = vector.broadcast %cst_15 : f32 to vector<8x256xf32>
    %24 = arith.cmpf ogt, %22, %23 : vector<8x256xf32>
    %cst_16 = arith.constant 0.000000e+00 : f32
    %25 = vector.broadcast %cst_16 : f32 to vector<8x256xf32>
    %26 = arith.minimumf %22, %25 : vector<8x256xf32>
    %27 = math.exp %26 : vector<8x256xf32>
    %cst_17 = arith.constant 1.000000e+00 : f32
    %28 = vector.broadcast %cst_17 : f32 to vector<8x256xf32>
    %29 = arith.subf %27, %28 : vector<8x256xf32>
    %cst_18 = arith.constant 1.67326319 : f32
    %30 = vector.broadcast %cst_18 : f32 to vector<8x256xf32>
    %31 = arith.mulf %30, %29 : vector<8x256xf32>
    %32 = arith.select %24, %22, %31 : vector<8x256xi1>, vector<8x256xf32>
    %cst_19 = arith.constant 1.05070102 : f32
    %33 = vector.broadcast %cst_19 : f32 to vector<8x256xf32>
    %34 = arith.mulf %33, %32 : vector<8x256xf32>
    %c0_20 = arith.constant 0 : index
    %c0_21 = arith.constant 0 : index
    %35 = vector.load %arg6[%c0_20, %c0_21] : memref<256x256xf32, #tpu.memory_space<vmem>>, vector<256x256xf32>
    %cst_22 = arith.constant dense<0.000000e+00> : vector<8x256xf32>
    %36 = tpu.matmul %34, %35, %cst_22 {dimension_numbers = #tpu.dot_dimension_numbers<[1], [0], [0], [1], [0, 0, 1, 1], [], []>} : vector<8x256xf32>, vector<256x256xf32>, vector<8x256xf32> -> vector<8x256xf32>
    %c0_23 = arith.constant 0 : index
    %c0_24 = arith.constant 0 : index
    %37 = vector.load %arg7[%c0_23, %c0_24] : memref<1x256xf32, #tpu.memory_space<vmem>>, vector<1x256xf32>
    %38 = vector.broadcast %37 : vector<1x256xf32> to vector<8x256xf32>
    %39 = arith.addf %36, %38 : vector<8x256xf32>
    %cst_25 = arith.constant 0.000000e+00 : f32
    %40 = vector.broadcast %cst_25 : f32 to vector<8x256xf32>
    %41 = arith.cmpf ogt, %39, %40 : vector<8x256xf32>
    %cst_26 = arith.constant 0.000000e+00 : f32
    %42 = vector.broadcast %cst_26 : f32 to vector<8x256xf32>
    %43 = arith.minimumf %39, %42 : vector<8x256xf32>
    %44 = math.exp %43 : vector<8x256xf32>
    %cst_27 = arith.constant 1.000000e+00 : f32
    %45 = vector.broadcast %cst_27 : f32 to vector<8x256xf32>
    %46 = arith.subf %44, %45 : vector<8x256xf32>
    %cst_28 = arith.constant 1.67326319 : f32
    %47 = vector.broadcast %cst_28 : f32 to vector<8x256xf32>
    %48 = arith.mulf %47, %46 : vector<8x256xf32>
    %49 = arith.select %41, %39, %48 : vector<8x256xi1>, vector<8x256xf32>
    %cst_29 = arith.constant 1.05070102 : f32
    %50 = vector.broadcast %cst_29 : f32 to vector<8x256xf32>
    %51 = arith.mulf %50, %49 : vector<8x256xf32>
    %c0_30 = arith.constant 0 : index
    %c0_31 = arith.constant 0 : index
    %52 = vector.load %arg8[%c0_30, %c0_31] : memref<256x128xf32, #tpu.memory_space<vmem>>, vector<256x128xf32>
    %cst_32 = arith.constant dense<0.000000e+00> : vector<8x128xf32>
    %53 = tpu.matmul %51, %52, %cst_32 {dimension_numbers = #tpu.dot_dimension_numbers<[1], [0], [0], [1], [0, 0, 1, 1], [], []>} : vector<8x256xf32>, vector<256x128xf32>, vector<8x128xf32> -> vector<8x128xf32>
    %c0_33 = arith.constant 0 : index
    %c0_34 = arith.constant 0 : index
    %54 = vector.load %arg9[%c0_33, %c0_34] : memref<1x128xf32, #tpu.memory_space<vmem>>, vector<1x128xf32>
    %55 = vector.broadcast %54 : vector<1x128xf32> to vector<8x128xf32>
    %56 = arith.addf %53, %55 : vector<8x128xf32>
    %c0_35 = arith.constant 0 : index
    %c0_36 = arith.constant 0 : index
    %57 = vector.load %arg10[%c0_35, %c0_36] : memref<8x128xf32, #tpu.memory_space<vmem>>, vector<8x128xf32>
    tpu.vector_store %arg10[%c0_35, %c0_36], %56 {strides = array<i32>} : memref<8x128xf32, #tpu.memory_space<vmem>>, vector<8x128xf32>,
    return
  }
  func.func @transform_0(%arg0: i32) -> (i32, i32) {
    %c0_i32 = arith.constant 0 : i32
    %c0_i32_0 = arith.constant 0 : i32
    return %arg0, %c0_i32 : i32, i32
  }
  func.func @transform_1(%arg0: i32) -> (i32, i32) {
    %c0_i32 = arith.constant 0 : i32
    %c0_i32_0 = arith.constant 0 : i32
    %c0_i32_1 = arith.constant 0 : i32
    return %c0_i32, %c0_i32_0 : i32, i32
  }
  func.func @transform_2(%arg0: i32) -> (i32, i32) {
    %c0_i32 = arith.constant 0 : i32
    %c0_i32_0 = arith.constant 0 : i32
    %c0_i32_1 = arith.constant 0 : i32
    return %c0_i32, %c0_i32_0 : i32, i32
  }
  func.func @transform_3(%arg0: i32) -> (i32, i32) {
    %c0_i32 = arith.constant 0 : i32
    %c0_i32_0 = arith.constant 0 : i32
    %c0_i32_1 = arith.constant 0 : i32
    return %c0_i32, %c0_i32_0 : i32, i32
  }
  func.func @transform_4(%arg0: i32) -> (i32, i32) {
    %c0_i32 = arith.constant 0 : i32
    %c0_i32_0 = arith.constant 0 : i32
    %c0_i32_1 = arith.constant 0 : i32
    return %c0_i32, %c0_i32_0 : i32, i32
  }
  func.func @transform_5(%arg0: i32) -> (i32, i32) {
    %c0_i32 = arith.constant 0 : i32
    %c0_i32_0 = arith.constant 0 : i32
    %c0_i32_1 = arith.constant 0 : i32
    return %c0_i32, %c0_i32_0 : i32, i32
  }
  func.func @transform_6(%arg0: i32) -> (i32, i32) {
    %c0_i32 = arith.constant 0 : i32
    %c0_i32_0 = arith.constant 0 : i32
    %c0_i32_1 = arith.constant 0 : i32
    return %c0_i32, %c0_i32_0 : i32, i32
  }
  func.func @transform_7(%arg0: i32) -> (i32, i32) {
    %c0_i32 = arith.constant 0 : i32
    %c0_i32_0 = arith.constant 0 : i32
    %c0_i32_1 = arith.constant 0 : i32
    return %c0_i32, %c0_i32_0 : i32, i32
  }
  func.func @transform_8(%arg0: i32) -> (i32, i32) {
    %c0_i32 = arith.constant 0 : i32
    %c0_i32_0 = arith.constant 0 : i32
    %c0_i32_1 = arith.constant 0 : i32
    return %c0_i32, %c0_i32_0 : i32, i32
  }
  func.func @transform_9(%arg0: i32) -> (i32, i32) {
    %c0_i32 = arith.constant 0 : i32
    %c0_i32_0 = arith.constant 0 : i32
    return %arg0, %c0_i32 : i32, i32
  }
}

</mosaic_0001>

<bundles_post_ra>
// kernel: tpu_custom_call.1
= control target key start
LH: loop header
LB: loop body
LE: loop exit
PB: predicated region body
PF: predicated region fallthrough
CT: control target
= control target key end

     0   :  { %14 = vsyncpa [#allocation3], 0  ;;  %s1202_s0 = inlined_call_operand.hbm [shape: f32[8,32], index: 0, kind: input, shape index: {}]   ;;  %s1203_s1 = inlined_call_operand.hbm [shape: f32[32,256], index: 1, kind: input, shape index: {}]   ;;  %s1204_s2 = inlined_call_operand.vmem [shape: f32[1,256], index: 2, kind: input, shape index: {}]   ;;  %s1205_s3 = inlined_call_operand.hbm [shape: f32[256,256], index: 3, kind: input, shape index: {}]   ;;  %s1206_s4 = inlined_call_operand.vmem [shape: f32[1,256], index: 4, kind: input, shape index: {}]   ;;  %s1207_s5 = inlined_call_operand.hbm [shape: f32[256,256], index: 5, kind: input, shape index: {}]   ;;  %s1208_s6 = inlined_call_operand.vmem [shape: f32[1,256], index: 6, kind: input, shape index: {}]   ;;  %s1209_s7 = inlined_call_operand.hbm [shape: f32[256,128], index: 7, kind: input, shape index: {}]   ;;  %s1210_s8 = inlined_call_operand.vmem [shape: f32[1,128], index: 8, kind: input, shape index: {}]   ;;  %s1211_s9 = inlined_call_operand.hbm [shape: f32[8,128], index: 9, kind: output, shape index: {}]  }
   0x1   :  { %15 = vsyncpa [#allocation6], 0 }
   0x2   :  { %16 = vsyncpa [#allocation9], 0 }
   0x3   :  { %17 = vsyncpa [#allocation4], 0  ;;  %s1038_s30 = smov [#allocation5]   ;;  %s898_s13 = scalar_lea.hbm %s1203_s1, 1024 }
   0x4   :  { %s33_s10 = sshll.u32 %s1038_s30, 4  ;;  %p899_p0 = scmp.ne.s32.totalorder %s1203_s1, %s898_s13  ;;  %s34_s10 = int_to_ptr.vmem [resolvable:$true] %s33_s10 }
   0x5   :  { %p902_p1 = scmp.lt.u32.totalorder %s898_s13, %s1203_s1 }
   0x7   :  { %p904_p2 = pnand %p902_p1, %p899_p0 }
   0x9   :  { %907 = shalt.err (!%p904_p2)
}
   0xa   :  { %s908_s18 = scalar_lea.vmem %s34_s10, 1024  ;;  %p913_p4 = scmp.lt.s32.totalorder %s34_s10, %s34_s10 }
   0xb   :  { %p909_p3 = scmp.ne.s32.totalorder %s34_s10, %s908_s18  ;;  %p914_p5 = scmp.lt.s32.totalorder %s908_s18, %s908_s18 }
   0xd   :  { %p915_p6 = por %p914_p5, %p913_p4 }
   0xf   :  { %p916_p7 = pnand %p915_p6, %p909_p3 }
  0x11   :  { %919 = shalt.err (!%p916_p7)
}
  0x12   :  { %s1039_s19 = smov 256   ;;  %s1040_s20 = smov 16  }
  0x13   :  { %39 = dma.hbm_to_vmem [thread:$0]  %s1203_s1, 1024, %s34_s10, [#allocation6], %s1039_s19, %s1039_s19, %s1040_s20  }
  0x14   :  { %s1041_s23 = smov [#allocation8]   ;;  %s1042_s25 = smov [#allocation2]  }
  0x15   :  { %s61_s24 = sshll.u32 %s1041_s23, 4  ;;  %s24_s26 = sshll.u32 %s1042_s25, 4  ;;  %s62_s24 = int_to_ptr.vmem [resolvable:$true] %s61_s24  ;;  %s25_s26 = int_to_ptr.vmem [resolvable:$true] %s24_s26 }
  0x16   :  { %s920_s29 = scalar_lea.hbm %s1207_s5, 8192 }
  0x17   :  { %p921_p8 = scmp.ne.s32.totalorder %s1207_s5, %s920_s29  ;;  %p924_p9 = scmp.lt.u32.totalorder %s920_s29, %s1207_s5 }
  0x19   :  { %p926_p10 = pnand %p924_p9, %p921_p8 }
  0x1b   :  { %929 = shalt.err (!%p926_p10)
}
  0x1c   :  { %s930_s1 = scalar_lea.vmem %s62_s24, 8192  ;;  %p935_p12 = scmp.lt.s32.totalorder %s62_s24, %s62_s24 }
  0x1d   :  { %p931_p11 = scmp.ne.s32.totalorder %s62_s24, %s930_s1  ;;  %p936_p13 = scmp.lt.s32.totalorder %s930_s1, %s930_s1 }
  0x1f   :  { %p937_p0 = por %p936_p13, %p935_p12 }
  0x21   :  { %p938_p1 = pnand %p937_p0, %p931_p11 }
  0x23   :  { %941 = shalt.err (!%p938_p1)
}
  0x24   :  { %67 = dma.hbm_to_vmem [thread:$0]  %s1207_s5, 8192, %s62_s24, [#allocation9], %s1039_s19, %s1039_s19, %s1040_s20  }
  0x25   :  { %s942_s17 = scalar_lea.hbm %s1202_s0, 128 }
  0x26   :  { %p943_p2 = scmp.ne.s32.totalorder %s1202_s0, %s942_s17  ;;  %p946_p3 = scmp.lt.u32.totalorder %s942_s17, %s1202_s0 }
  0x28   :  { %p948_p4 = pnand %p946_p3, %p943_p2 }
  0x2a   :  { %951 = shalt.err (!%p948_p4)
}
  0x2b   :  { %s952_s25 = scalar_lea.vmem %s25_s26, 128  ;;  %p957_p6 = scmp.lt.s32.totalorder %s25_s26, %s25_s26 }
  0x2c   :  { %p953_p5 = scmp.ne.s32.totalorder %s25_s26, %s952_s25  ;;  %p958_p7 = scmp.lt.s32.totalorder %s952_s25, %s952_s25 }
  0x2e   :  { %p959_p8 = por %p958_p7, %p957_p6 }
  0x30   :  { %p960_p9 = pnand %p959_p8, %p953_p5 }
  0x32   :  { %963 = shalt.err (!%p960_p9)
}
  0x33   :  { %27 = dma.hbm_to_vmem [thread:$0]  %s1202_s0, 128, %s25_s26, [#allocation3]  }
  0x34   :  { %s1043_s27 = smov [#allocation7]   ;;  %s1044_s29 = smov [#allocation10]  }
  0x35   :  { %s47_s28 = sshll.u32 %s1043_s27, 4  ;;  %s75_s30 = sshll.u32 %s1044_s29, 4  ;;  %s48_s28 = int_to_ptr.vmem [resolvable:$true] %s47_s28  ;;  %s76_s30 = int_to_ptr.vmem [resolvable:$true] %s75_s30 }
  0x36   :  { %s964_s13 = scalar_lea.hbm %s1205_s3, 8192 }
  0x37   :  { %p965_p10 = scmp.ne.s32.totalorder %s1205_s3, %s964_s13  ;;  %p968_p11 = scmp.lt.u32.totalorder %s964_s13, %s1205_s3 }
  0x39   :  { %p970_p12 = pnand %p968_p11, %p965_p10 }
  0x3b   :  { %973 = shalt.err (!%p970_p12)
}
  0x3c   :  { %s974_s0 = scalar_lea.vmem %s48_s28, 8192  ;;  %p979_p0 = scmp.lt.s32.totalorder %s48_s28, %s48_s28 }
  0x3d   :  { %p975_p13 = scmp.ne.s32.totalorder %s48_s28, %s974_s0  ;;  %p980_p1 = scmp.lt.s32.totalorder %s974_s0, %s974_s0 }
  0x3f   :  { %p981_p2 = por %p980_p1, %p979_p0 }
  0x41   :  { %p982_p3 = pnand %p981_p2, %p975_p13 }
  0x43   :  { %985 = shalt.err (!%p982_p3)
}
  0x44   :  { %53 = dma.hbm_to_vmem [thread:$0]  %s1205_s3, 8192, %s48_s28, [#allocation6], %s1039_s19, %s1039_s19, %s1040_s20  }
  0x45   :  { %s986_s21 = scalar_lea.hbm %s1209_s7, 4096 }
  0x46   :  { %p987_p4 = scmp.ne.s32.totalorder %s1209_s7, %s986_s21  ;;  %p990_p5 = scmp.lt.u32.totalorder %s986_s21, %s1209_s7 }
  0x48   :  { %p992_p6 = pnand %p990_p5, %p987_p4 }
  0x4a   :  { %995 = shalt.err (!%p992_p6)
}
  0x4b   :  { %s996_s24 = scalar_lea.vmem %s76_s30, 4096  ;;  %p1001_p8 = scmp.lt.s32.totalorder %s76_s30, %s76_s30 }
  0x4c   :  { %p997_p7 = scmp.ne.s32.totalorder %s76_s30, %s996_s24  ;;  %p1002_p9 = scmp.lt.s32.totalorder %s996_s24, %s996_s24 }
  0x4e   :  { %p1003_p10 = por %p1002_p9, %p1001_p8 }
  0x50   :  { %p1004_p11 = pnand %p1003_p10, %p997_p7 }
  0x52   :  { %1007 = shalt.err (!%p1004_p11)
}
  0x53   :  { %s1045_s3 = smov 128   ;;  %s1046_s19 = smov 8  }
  0x54   :  { %81 = dma.hbm_to_vmem [thread:$0]  %s1209_s7, 4096, %s76_s30, [#allocation9], %s1045_s3, %s1045_s3, %s1046_s19  }
  0x55   :  { %1030 = dma.done.wait [#allocation3], 128  }
  0x56   :  { %1031 = vsyncadd [#allocation3], 4294967168 }
  0x57   :  { %1032 = dma.done.wait [#allocation6], 9216  }
  0x58   :  { %1033 = vsyncadd [#allocation6], 4294958080 }
  0x59   :  { %1034 = dma.done.wait [#allocation9], 12288  }
  0x5a   :  { %1035 = vsyncadd [#allocation9], 4294955008  ;;  %v1047_v0 = vmov 0.0   ;;  %v101_v1 = vld [vmem:[#allocation5 + $0x8] sm:$0xff]  ;;  %v103_v2 = vld [vmem:[#allocation5 + $0x18] sm:$0xff]  ;;  %vm120_vm0 = vcmask 261120  }
  0x5b   :  { %188 = vmatprep.mubr.f32.mxu0 %v1047_v0  ;;  %v100_v3 = vld [vmem:[#allocation5] sm:$0xff]  ;;  %v707_v4 = vpack.c.bf16 %v103_v2, %v101_v1  ;;  %v102_v5 = vld [vmem:[#allocation5 + $0x10] sm:$0xff]  ;;  %v105_v6 = vld [vmem:[#allocation5 + $0x28] sm:$0xff]  ;;  %s1048_s12 = smov [#allocation11]  }
  0x5c   :  { %v107_v7 = vld [vmem:[#allocation5 + $0x38] sm:$0xff]  ;;  %v709_v8 = vpack.c.bf16 %v102_v5, %v100_v3  ;;  %v104_v10 = vld [vmem:[#allocation5 + $0x20] sm:$0xff]  ;;  %v106_v11 = vld [vmem:[#allocation5 + $0x30] sm:$0xff]  ;;  %s653_s13 = sshll.u32 %s1048_s12, 4  ;;  %s654_s13 = int_to_ptr.vmem [resolvable:$true] %s653_s13 }
  0x5d   :  { %v711_v9 = vpack.c.bf16 %v107_v7, %v105_v6  ;;  %708 = vmatprep.subr.bf16.mxu0 %v707_v4  ;;  %v212_v12 = vld [vmem:[#allocation7 + $0x8] sm:$0xff]  ;;  %v214_v13 = vld [vmem:[#allocation7 + $0x18] sm:$0xff]  ;;  %v211_v14 = vld [vmem:[#allocation7] sm:$0xff]  ;;  %v713_v15 = vpack.c.bf16 %v106_v11, %v104_v10  ;;  %s1008_s1 = scalar_lea.vmem %s654_s13, 128  ;;  %p1013_p13 = scmp.lt.s32.totalorder %s654_s13, %s654_s13 }
  0x5e   :  { %710 = vmatpush1.bf16.msra.mxu0 %v709_v8  ;;  %v715_v16 = vpack.c.bf16 %v214_v13, %v212_v12  ;;  %v213_v17 = vld [vmem:[#allocation7 + $0x10] sm:$0xff]  ;;  %v216_v18 = vld [vmem:[#allocation7 + $0x28] sm:$0xff]  ;;  %v218_v19 = vld [vmem:[#allocation7 + $0x38] sm:$0xff]  ;;  %p1009_p12 = scmp.ne.s32.totalorder %s654_s13, %s1008_s1  ;;  %p1014_p0 = scmp.lt.s32.totalorder %s1008_s1, %s1008_s1 }
  0x5f   :  { %712 = vmatprep.subr.bf16.mxu0 %v711_v9  ;;  %v717_v20 = vpack.c.bf16 %v213_v17, %v211_v14  ;;  %v719_v21 = vpack.c.bf16 %v218_v19, %v216_v18  ;;  %v215_v22 = vld [vmem:[#allocation7 + $0x20] sm:$0xff]  ;;  %v217_v23 = vld [vmem:[#allocation7 + $0x30] sm:$0xff]  ;;  %v220_v24 = vld [vmem:[#allocation7 + $0x48] sm:$0xff] }
  0x60   :  { %716 = vmatprep.subr.bf16.mxu1 %v715_v16  ;;  %v222_v25 = vld [vmem:[#allocation7 + $0x58] sm:$0xff]  ;;  %v721_v26 = vpack.c.bf16 %v217_v23, %v215_v22  ;;  %v219_v29 = vld [vmem:[#allocation7 + $0x40] sm:$0xff]  ;;  %v221_v30 = vld [vmem:[#allocation7 + $0x50] sm:$0xff]  ;;  %p1015_p1 = por %p1014_p0, %p1013_p13 }
  0x61   :  { %718 = vmatpush1.bf16.msra.mxu1 %v717_v20  ;;  %v99_v27 = vld [vmem:[#allocation2] sm:$0xff]  ;;  %v723_v28 = vpack.c.bf16 %v222_v25, %v220_v24  ;;  %v224_v31 = vld [vmem:[#allocation7 + $0x68] sm:$0xff]  ;;  %v725_v33 = vpack.c.bf16 %v221_v30, %v219_v29  ;;  %v223_v35 = vld [vmem:[#allocation7 + $0x60] sm:$0xff] }
  0x62   :  { %714 = vmatpush1.bf16.msra.mxu0 %v713_v15  ;;  %720 = vmatprep.subr.bf16.mxu1 %v719_v21  ;;  %v226_v32 = vld [vmem:[#allocation7 + $0x78] sm:$0xff]  ;;  %v225_v36 = vld [vmem:[#allocation7 + $0x70] sm:$0xff]  ;;  %v228_v37 = vld [vmem:[#allocation7 + $0x88] sm:$0xff]  ;;  %p1016_p2 = pnand %p1015_p1, %p1009_p12 }
  0x63   :  { %v727_v34 = vpack.c.bf16 %v226_v32, %v224_v31  ;;  %v230_v38 = vld [vmem:[#allocation7 + $0x98] sm:$0xff]  ;;  %v729_v39 = vpack.c.bf16 %v225_v36, %v223_v35  ;;  %v227_v41 = vld [vmem:[#allocation7 + $0x80] sm:$0xff]  ;;  %v229_v42 = vld [vmem:[#allocation7 + $0x90] sm:$0xff] }
  0x64   :  { %v731_v40 = vpack.c.bf16 %v230_v38, %v228_v37  ;;  %v232_v43 = vld [vmem:[#allocation7 + $0xa8] sm:$0xff]  ;;  %v234_v44 = vld [vmem:[#allocation7 + $0xb8] sm:$0xff]  ;;  %v733_v45 = vpack.c.bf16 %v229_v42, %v227_v41  ;;  %v231_v47 = vld [vmem:[#allocation7 + $0xa0] sm:$0xff] }
  0x65   :  { %664 = vmatmul.mubr.msk.f32.vlgmr.msra.gmra.mrb[0].mxu0 %vm120_vm0, %v99_v27  ;;  %722 = vmatpush1.bf16.msra.mxu1 %v721_v26  ;;  %v735_v46 = vpack.c.bf16 %v234_v44, %v232_v43  ;;  %v233_v48 = vld [vmem:[#allocation7 + $0xb0] sm:$0xff]  ;;  %v236_v49 = vld [vmem:[#allocation7 + $0xc8] sm:$0xff]  ;;  %v238_v50 = vld [vmem:[#allocation7 + $0xd8] sm:$0xff] }
  0x66   :  { %724 = vmatprep.subr.bf16.mxu1 %v723_v28  ;;  %v737_v51 = vpack.c.bf16 %v233_v48, %v231_v47  ;;  %v739_v52 = vpack.c.bf16 %v238_v50, %v236_v49  ;;  %v235_v53 = vld [vmem:[#allocation7 + $0xc0] sm:$0xff]  ;;  %v237_v54 = vld [vmem:[#allocation7 + $0xd0] sm:$0xff]  ;;  %v240_v55 = vld [vmem:[#allocation7 + $0xe8] sm:$0xff] }
  0x67   :  { %v242_v56 = vld [vmem:[#allocation7 + $0xf8] sm:$0xff]  ;;  %v741_v57 = vpack.c.bf16 %v237_v54, %v235_v53  ;;  %v239_v59 = vld [vmem:[#allocation7 + $0xe0] sm:$0xff]  ;;  %v241_v60 = vld [vmem:[#allocation7 + $0xf0] sm:$0xff] }
  0x68   :  { %v743_v58 = vpack.c.bf16 %v242_v56, %v240_v55  ;;  %v244_v61 = vld [vmem:[#allocation7 + $0x108] sm:$0xff]  ;;  %v246_v62 = vld [vmem:[#allocation7 + $0x118] sm:$0xff]  ;;  %v745_v63 = vpack.c.bf16 %v241_v60, %v239_v59  ;;  %v243_v1 = vld [vmem:[#allocation7 + $0x100] sm:$0xff] }
  0x69   :  { %726 = vmatpush1.bf16.msra.mxu1 %v725_v33  ;;  %v747_v0 = vpack.c.bf16 %v246_v62, %v244_v61  ;;  %v245_v2 = vld [vmem:[#allocation7 + $0x110] sm:$0xff]  ;;  %v248_v3 = vld [vmem:[#allocation7 + $0x128] sm:$0xff]  ;;  %v250_v4 = vld [vmem:[#allocation7 + $0x138] sm:$0xff] }
  0x6a   :  { %728 = vmatprep.subr.bf16.mxu1 %v727_v34  ;;  %v749_v5 = vpack.c.bf16 %v245_v2, %v243_v1  ;;  %v751_v6 = vpack.c.bf16 %v250_v4, %v248_v3  ;;  %v247_v7 = vld [vmem:[#allocation7 + $0x120] sm:$0xff]  ;;  %v249_v8 = vld [vmem:[#allocation7 + $0x130] sm:$0xff]  ;;  %v252_v10 = vld [vmem:[#allocation7 + $0x148] sm:$0xff] }
  0x6b   :  { %v753_v9 = vpack.c.bf16 %v249_v8, %v247_v7  ;;  %v254_v11 = vld [vmem:[#allocation7 + $0x158] sm:$0xff]  ;;  %v251_v13 = vld [vmem:[#allocation7 + $0x140] sm:$0xff]  ;;  %v253_v14 = vld [vmem:[#allocation7 + $0x150] sm:$0xff] }
  0x6c   :  { %v755_v12 = vpack.c.bf16 %v254_v11, %v252_v10  ;;  %v757_v15 = vpack.c.bf16 %v253_v14, %v251_v13  ;;  %v256_v16 = vld [vmem:[#allocation7 + $0x168] sm:$0xff]  ;;  %v258_v17 = vld [vmem:[#allocation7 + $0x178] sm:$0xff]  ;;  %v255_v19 = vld [vmem:[#allocation7 + $0x160] sm:$0xff] }
  0x6d   :  { %730 = vmatpush1.bf16.msra.mxu1 %v729_v39  ;;  %v759_v18 = vpack.c.bf16 %v258_v17, %v256_v16  ;;  %v257_v20 = vld [vmem:[#allocation7 + $0x170] sm:$0xff]  ;;  %v260_v22 = vld [vmem:[#allocation7 + $0x188] sm:$0xff]  ;;  %v262_v23 = vld [vmem:[#allocation7 + $0x198] sm:$0xff] }
  0x6e   :  { %732 = vmatprep.subr.bf16.mxu1 %v731_v40  ;;  %v761_v21 = vpack.c.bf16 %v257_v20, %v255_v19  ;;  %v763_v24 = vpack.c.bf16 %v262_v23, %v260_v22  ;;  %v259_v25 = vld [vmem:[#allocation7 + $0x180] sm:$0xff]  ;;  %v261_v26 = vld [vmem:[#allocation7 + $0x190] sm:$0xff]  ;;  %v264_v28 = vld [vmem:[#allocation7 + $0x1a8] sm:$0xff] }
  0x6f   :  { %v765_v27 = vpack.c.bf16 %v261_v26, %v259_v25  ;;  %v266_v29 = vld [vmem:[#allocation7 + $0x1b8] sm:$0xff]  ;;  %v263_v31 = vld [vmem:[#allocation7 + $0x1a0] sm:$0xff]  ;;  %v265_v32 = vld [vmem:[#allocation7 + $0x1b0] sm:$0xff] }
  0x70   :  { %v767_v30 = vpack.c.bf16 %v266_v29, %v264_v28  ;;  %v769_v33 = vpack.c.bf16 %v265_v32, %v263_v31  ;;  %v268_v34 = vld [vmem:[#allocation7 + $0x1c8] sm:$0xff]  ;;  %v270_v35 = vld [vmem:[#allocation7 + $0x1d8] sm:$0xff]  ;;  %v267_v37 = vld [vmem:[#allocation7 + $0x1c0] sm:$0xff] }
  0x71   :  { %734 = vmatpush1.bf16.msra.mxu1 %v733_v45  ;;  %v771_v36 = vpack.c.bf16 %v270_v35, %v268_v34  ;;  %v269_v38 = vld [vmem:[#allocation7 + $0x1d0] sm:$0xff]  ;;  %v272_v40 = vld [vmem:[#allocation7 + $0x1e8] sm:$0xff]  ;;  %v274_v41 = vld [vmem:[#allocation7 + $0x1f8] sm:$0xff] }
  0x72   :  { %736 = vmatprep.subr.bf16.mxu1 %v735_v46  ;;  %v773_v39 = vpack.c.bf16 %v269_v38, %v267_v37  ;;  %v271_v42 = vld [vmem:[#allocation7 + $0x1e0] sm:$0xff]  ;;  %v775_v43 = vpack.c.bf16 %v274_v41, %v272_v40  ;;  %v273_v44 = vld [vmem:[#allocation7 + $0x1f0] sm:$0xff]  ;;  %v375_v46 = vld [vmem:[#allocation8 + $0x8] sm:$0xff] }
  0x73   :  { %v777_v45 = vpack.c.bf16 %v273_v44, %v271_v42  ;;  %v377_v47 = vld [vmem:[#allocation8 + $0x18] sm:$0xff]  ;;  %v374_v48 = vld [vmem:[#allocation8] sm:$0xff]  ;;  %v376_v50 = vld [vmem:[#allocation8 + $0x10] sm:$0xff] }
  0x74   :  { %v779_v49 = vpack.c.bf16 %v377_v47, %v375_v46  ;;  %v781_v53 = vpack.c.bf16 %v376_v50, %v374_v48  ;;  %v378_v55 = vld [vmem:[#allocation8 + $0x20] sm:$0xff]  ;;  %v380_v56 = vld [vmem:[#allocation8 + $0x30] sm:$0xff]  ;;  %v395_v11 = vld [vmem:[#allocation8 + $0xa8] sm:$0xff] }
  0x75   :  { %738 = vmatpush1.bf16.msra.mxu1 %v737_v51  ;;  %v379_v51 = vld [vmem:[#allocation8 + $0x28] sm:$0xff]  ;;  %v785_v59 = vpack.c.bf16 %v380_v56, %v378_v55  ;;  %v382_v61 = vld [vmem:[#allocation8 + $0x40] sm:$0xff]  ;;  %v384_v62 = vld [vmem:[#allocation8 + $0x50] sm:$0xff] }
  0x76   :  { %740 = vmatprep.subr.bf16.mxu1 %v739_v52  ;;  %v381_v52 = vld [vmem:[#allocation8 + $0x38] sm:$0xff]  ;;  %780 = vmatprep.subr.bf16.mxu0 %v779_v49  ;;  %v789_v1 = vpack.c.bf16 %v384_v62, %v382_v61  ;;  %v386_v3 = vld [vmem:[#allocation8 + $0x60] sm:$0xff]  ;;  %v388_v4 = vld [vmem:[#allocation8 + $0x70] sm:$0xff] }
  0x77   :  { %v783_v54 = vpack.c.bf16 %v381_v52, %v379_v51  ;;  %782 = vmatpush1.bf16.msra.mxu0 %v781_v53  ;;  %v793_v7 = vpack.c.bf16 %v388_v4, %v386_v3  ;;  %v392_v10 = vld [vmem:[#allocation8 + $0x90] sm:$0xff]  ;;  %v399_v17 = vld [vmem:[#allocation8 + $0xc8] sm:$0xff]  ;;  %v108_v42 = vld [vmem:[%s1204_s2] sm:$0x3] }
  0x78   :  { %v396_v16 = vld [vmem:[#allocation8 + $0xb0] sm:$0xff]  ;;  %v403_v23 = vld [vmem:[#allocation8 + $0xe8] sm:$0xff]  ;;  %v417_v4 = vld [vmem:[#allocation8 + $0x158] sm:$0xff] }
  0x79   :  { %742 = vmatpush1.bf16.msra.mxu1 %v741_v57  ;;  %v383_v57 = vld [vmem:[#allocation8 + $0x48] sm:$0xff]  ;;  %784 = vmatprep.subr.bf16.mxu0 %v783_v54  ;;  %v400_v22 = vld [vmem:[#allocation8 + $0xd0] sm:$0xff] }
  0x7a   :  { %744 = vmatprep.subr.bf16.mxu1 %v743_v58  ;;  %v385_v58 = vld [vmem:[#allocation8 + $0x58] sm:$0xff]  ;;  %v404_v28 = vld [vmem:[#allocation8 + $0xf0] sm:$0xff]  ;;  %v407_v29 = vld [vmem:[#allocation8 + $0x108] sm:$0xff] }
  0x7b   :  { %v787_v60 = vpack.c.bf16 %v385_v58, %v383_v57  ;;  %786 = vmatpush1.bf16.msra.mxu0 %v785_v59  ;;  %v408_v34 = vld [vmem:[#allocation8 + $0x110] sm:$0xff]  ;;  %v411_v35 = vld [vmem:[#allocation8 + $0x128] sm:$0xff] }
  0x7c   :  { %v415_v3 = vld [vmem:[#allocation8 + $0x148] sm:$0xff] }
  0x7d   :  { %746 = vmatpush1.bf16.msra.mxu1 %v745_v63  ;;  %v387_v63 = vld [vmem:[#allocation8 + $0x68] sm:$0xff]  ;;  %788 = vmatprep.subr.bf16.mxu0 %v787_v60 }
  0x7e   :  { %748 = vmatprep.subr.bf16.mxu1 %v747_v0  ;;  %v389_v0 = vld [vmem:[#allocation8 + $0x78] sm:$0xff] }
  0x7f   :  { %v791_v2 = vpack.c.bf16 %v389_v0, %v387_v63  ;;  %790 = vmatpush1.bf16.msra.mxu0 %v789_v1  ;;  %v410_v0 = vld [vmem:[#allocation8 + $0x120] sm:$0xff]  ;;  %v412_v1 = vld [vmem:[#allocation8 + $0x130] sm:$0xff] }
  0x81   :  { %750 = vmatpush1.bf16.msra.mxu1 %v749_v5  ;;  %v391_v5 = vld [vmem:[#allocation8 + $0x88] sm:$0xff]  ;;  %792 = vmatprep.subr.bf16.mxu0 %v791_v2  ;;  %v817_v2 = vpack.c.bf16 %v412_v1, %v410_v0 }
  0x82   :  { %752 = vmatprep.subr.bf16.mxu1 %v751_v6  ;;  %v393_v6 = vld [vmem:[#allocation8 + $0x98] sm:$0xff] }
  0x83   :  { %v795_v8 = vpack.c.bf16 %v393_v6, %v391_v5  ;;  %794 = vmatpush1.bf16.msra.mxu0 %v793_v7  ;;  %v819_v5 = vpack.c.bf16 %v417_v4, %v415_v3  ;;  %v414_v6 = vld [vmem:[#allocation8 + $0x140] sm:$0xff]  ;;  %v416_v7 = vld [vmem:[#allocation8 + $0x150] sm:$0xff] }
  0x85   :  { %754 = vmatpush1.bf16.msra.mxu1 %v753_v9  ;;  %v390_v9 = vld [vmem:[#allocation8 + $0x80] sm:$0xff]  ;;  %796 = vmatprep.subr.bf16.mxu0 %v795_v8  ;;  %v821_v8 = vpack.c.bf16 %v416_v7, %v414_v6  ;;  %v539_v7 = vld [vmem:[#allocation10 + $0x10] sm:$0xff] }
  0x86   :  { %756 = vmatprep.subr.bf16.mxu1 %v755_v12  ;;  %v397_v12 = vld [vmem:[#allocation8 + $0xb8] sm:$0xff]  ;;  %v797_v13 = vpack.c.bf16 %v392_v10, %v390_v9  ;;  %v419_v9 = vld [vmem:[#allocation8 + $0x168] sm:$0xff] }
  0x87   :  { %v799_v14 = vpack.c.bf16 %v397_v12, %v395_v11  ;;  %v421_v10 = vld [vmem:[#allocation8 + $0x178] sm:$0xff]  ;;  %v418_v12 = vld [vmem:[#allocation8 + $0x160] sm:$0xff] }
  0x88   :  { %798 = vmatpush1.bf16.msra.mxu0 %v797_v13  ;;  %v823_v11 = vpack.c.bf16 %v421_v10, %v419_v9  ;;  %v420_v13 = vld [vmem:[#allocation8 + $0x170] sm:$0xff]  ;;  %v557_v10 = vld [vmem:[#allocation10 + $0xa0] sm:$0xff] }
  0x89   :  { %758 = vmatpush1.bf16.msra.mxu1 %v757_v15  ;;  %v394_v15 = vld [vmem:[#allocation8 + $0xa0] sm:$0xff]  ;;  %800 = vmatprep.subr.bf16.mxu0 %v799_v14  ;;  %v825_v14 = vpack.c.bf16 %v420_v13, %v418_v12 }
  0x8a   :  { %760 = vmatprep.subr.bf16.mxu1 %v759_v18  ;;  %v401_v18 = vld [vmem:[#allocation8 + $0xd8] sm:$0xff]  ;;  %v801_v19 = vpack.c.bf16 %v396_v16, %v394_v15  ;;  %v423_v15 = vld [vmem:[#allocation8 + $0x188] sm:$0xff]  ;;  %v541_v13 = vld [vmem:[#allocation10 + $0x20] sm:$0xff] }
  0x8b   :  { %v803_v20 = vpack.c.bf16 %v401_v18, %v399_v17  ;;  %v425_v16 = vld [vmem:[#allocation8 + $0x198] sm:$0xff]  ;;  %v422_v18 = vld [vmem:[#allocation8 + $0x180] sm:$0xff] }
  0x8c   :  { %802 = vmatpush1.bf16.msra.mxu0 %v801_v19  ;;  %v827_v17 = vpack.c.bf16 %v425_v16, %v423_v15  ;;  %v424_v19 = vld [vmem:[#allocation8 + $0x190] sm:$0xff] }
  0x8d   :  { %762 = vmatpush1.bf16.msra.mxu1 %v761_v21  ;;  %v398_v21 = vld [vmem:[#allocation8 + $0xc0] sm:$0xff]  ;;  %804 = vmatprep.subr.bf16.mxu0 %v803_v20  ;;  %v829_v20 = vpack.c.bf16 %v424_v19, %v422_v18  ;;  %v559_v16 = vld [vmem:[#allocation10 + $0xb0] sm:$0xff] }
  0x8e   :  { %764 = vmatprep.subr.bf16.mxu1 %v763_v24  ;;  %v405_v24 = vld [vmem:[#allocation8 + $0xf8] sm:$0xff]  ;;  %v805_v25 = vpack.c.bf16 %v400_v22, %v398_v21  ;;  %v427_v21 = vld [vmem:[#allocation8 + $0x1a8] sm:$0xff]  ;;  %v543_v19 = vld [vmem:[#allocation10 + $0x30] sm:$0xff] }
  0x8f   :  { %v807_v26 = vpack.c.bf16 %v405_v24, %v403_v23  ;;  %v429_v22 = vld [vmem:[#allocation8 + $0x1b8] sm:$0xff]  ;;  %v426_v24 = vld [vmem:[#allocation8 + $0x1a0] sm:$0xff] }
  0x90   :  { %806 = vmatpush1.bf16.msra.mxu0 %v805_v25  ;;  %v831_v23 = vpack.c.bf16 %v429_v22, %v427_v21  ;;  %v428_v25 = vld [vmem:[#allocation8 + $0x1b0] sm:$0xff]  ;;  %v561_v22 = vld [vmem:[#allocation10 + $0xc0] sm:$0xff] }
  0x91   :  { %766 = vmatpush1.bf16.msra.mxu1 %v765_v27  ;;  %v402_v27 = vld [vmem:[#allocation8 + $0xe0] sm:$0xff]  ;;  %808 = vmatprep.subr.bf16.mxu0 %v807_v26  ;;  %v833_v26 = vpack.c.bf16 %v428_v25, %v426_v24 }
  0x92   :  { %768 = vmatprep.subr.bf16.mxu1 %v767_v30  ;;  %v409_v30 = vld [vmem:[#allocation8 + $0x118] sm:$0xff]  ;;  %v809_v31 = vpack.c.bf16 %v404_v28, %v402_v27  ;;  %v431_v27 = vld [vmem:[#allocation8 + $0x1c8] sm:$0xff]  ;;  %v545_v25 = vld [vmem:[#allocation10 + $0x40] sm:$0xff] }
  0x93   :  { %v811_v32 = vpack.c.bf16 %v409_v30, %v407_v29  ;;  %v433_v28 = vld [vmem:[#allocation8 + $0x1d8] sm:$0xff]  ;;  %v430_v30 = vld [vmem:[#allocation8 + $0x1c0] sm:$0xff] }
  0x94   :  { %810 = vmatpush1.bf16.msra.mxu0 %v809_v31  ;;  %v835_v29 = vpack.c.bf16 %v433_v28, %v431_v27  ;;  %v432_v31 = vld [vmem:[#allocation8 + $0x1d0] sm:$0xff] }
  0x95   :  { %770 = vmatpush1.bf16.msra.mxu1 %v769_v33  ;;  %v406_v33 = vld [vmem:[#allocation8 + $0x100] sm:$0xff]  ;;  %812 = vmatprep.subr.bf16.mxu0 %v811_v32  ;;  %v837_v32 = vpack.c.bf16 %v432_v31, %v430_v30  ;;  %v563_v28 = vld [vmem:[#allocation10 + $0xd0] sm:$0xff] }
  0x96   :  { %772 = vmatprep.subr.bf16.mxu1 %v771_v36  ;;  %v413_v36 = vld [vmem:[#allocation8 + $0x138] sm:$0xff]  ;;  %v813_v37 = vpack.c.bf16 %v408_v34, %v406_v33  ;;  %v435_v33 = vld [vmem:[#allocation8 + $0x1e8] sm:$0xff]  ;;  %v547_v31 = vld [vmem:[#allocation10 + $0x50] sm:$0xff] }
  0x97   :  { %v815_v38 = vpack.c.bf16 %v413_v36, %v411_v35  ;;  %v437_v34 = vld [vmem:[#allocation8 + $0x1f8] sm:$0xff]  ;;  %v434_v36 = vld [vmem:[#allocation8 + $0x1e0] sm:$0xff] }
  0x98   :  { %814 = vmatpush1.bf16.msra.mxu0 %v813_v37  ;;  %v839_v35 = vpack.c.bf16 %v437_v34, %v435_v33  ;;  %v436_v37 = vld [vmem:[#allocation8 + $0x1f0] sm:$0xff]  ;;  %v565_v34 = vld [vmem:[#allocation10 + $0xe0] sm:$0xff] }
  0x99   :  { %774 = vmatpush1.bf16.msra.mxu1 %v773_v39  ;;  %816 = vmatprep.subr.bf16.mxu0 %v815_v38  ;;  %v110_v39 = vlaneseq  ;;  %v841_v38 = vpack.c.bf16 %v436_v37, %v434_v36  ;;  %v549_v37 = vld [vmem:[#allocation10 + $0x60] sm:$0xff] }
  0x9a   :  { %776 = vmatprep.subr.bf16.mxu1 %v775_v43 }
  0x9b   :  { %v111_v40 = vshrl.u32 %v110_v39, 7  ;;  %v553_v39 = vld [vmem:[#allocation10 + $0x80] sm:$0xff] }
  0x9c   :  { %818 = vmatpush1.bf16.msra.mxu0 %v817_v2 }
  0x9d   :  { %778 = vmatpush1.bf16.msra.mxu1 %v777_v45  ;;  %v1168_v41 = vsub.s32 0, %v111_v40  ;;  %v1173_v43 = vsub.s32 1, %v111_v40  ;;  %820 = vmatprep.subr.bf16.mxu0 %v819_v5  ;;  %v554_v40 = vld [vmem:[#allocation10 + $0x88] sm:$0xff] }
  0x9f   :  { %v113_v44 = vrot.slane %v108_v42, %v1168_v41  ;;  %v117_v45 = vrot.slane %v108_v42, %v1173_v43  ;;  %v537_v42 = vld [vmem:[#allocation10] sm:$0xff] }
  0xa0   :  { %822 = vmatpush1.bf16.msra.mxu0 %v821_v8  ;;  %v540_v8 = vld [vmem:[#allocation10 + $0x18] sm:$0xff] }
  0xa1   :  { %824 = vmatprep.subr.bf16.mxu0 %v823_v11  ;;  %v849_v9 = vpack.c.bf16 %v540_v8, %v539_v7  ;;  %v558_v11 = vld [vmem:[#allocation10 + $0xa8] sm:$0xff] }
  0xa2   :  { %v851_v12 = vpack.c.bf16 %v558_v11, %v557_v10 }
  0xa4   :  { %826 = vmatpush1.bf16.msra.mxu0 %v825_v14  ;;  %v542_v14 = vld [vmem:[#allocation10 + $0x28] sm:$0xff] }
  0xa5   :  { %828 = vmatprep.subr.bf16.mxu0 %v827_v17  ;;  %v853_v15 = vpack.c.bf16 %v542_v14, %v541_v13  ;;  %v560_v17 = vld [vmem:[#allocation10 + $0xb8] sm:$0xff] }
  0xa6   :  { %v855_v18 = vpack.c.bf16 %v560_v17, %v559_v16 }
  0xa8   :  { %830 = vmatpush1.bf16.msra.mxu0 %v829_v20  ;;  %v544_v20 = vld [vmem:[#allocation10 + $0x38] sm:$0xff] }
  0xa9   :  { %832 = vmatprep.subr.bf16.mxu0 %v831_v23  ;;  %v857_v21 = vpack.c.bf16 %v544_v20, %v543_v19  ;;  %v562_v23 = vld [vmem:[#allocation10 + $0xc8] sm:$0xff] }
  0xaa   :  { %v859_v24 = vpack.c.bf16 %v562_v23, %v561_v22 }
  0xac   :  { %834 = vmatpush1.bf16.msra.mxu0 %v833_v26  ;;  %v546_v26 = vld [vmem:[#allocation10 + $0x48] sm:$0xff] }
  0xad   :  { %836 = vmatprep.subr.bf16.mxu0 %v835_v29  ;;  %v861_v27 = vpack.c.bf16 %v546_v26, %v545_v25  ;;  %v564_v29 = vld [vmem:[#allocation10 + $0xd8] sm:$0xff] }
  0xae   :  { %v863_v30 = vpack.c.bf16 %v564_v29, %v563_v28 }
  0xb0   :  { %838 = vmatpush1.bf16.msra.mxu0 %v837_v32  ;;  %v548_v32 = vld [vmem:[#allocation10 + $0x58] sm:$0xff] }
  0xb1   :  { %840 = vmatprep.subr.bf16.mxu0 %v839_v35  ;;  %v865_v33 = vpack.c.bf16 %v548_v32, %v547_v31  ;;  %v566_v35 = vld [vmem:[#allocation10 + $0xe8] sm:$0xff] }
  0xb2   :  { %v867_v36 = vpack.c.bf16 %v566_v35, %v565_v34 }
  0xb4   :  { %842 = vmatpush1.bf16.msra.mxu0 %v841_v38  ;;  %v550_v38 = vld [vmem:[#allocation10 + $0x68] sm:$0xff] }
 0x138   :  { %v190_v46 = vpop.f32.mrb[0].mxu0 }
 0x139   :  { %v191_v47 = vadd.f32 %v190_v46, %v113_v44  ;;  %v192_v48 = vpop.f32.mrb[1].mxu0  ;;  %v843_v44 = vpack.c.bf16 %v554_v40, %v553_v39  ;;  %v555_v46 = vld [vmem:[#allocation10 + $0x90] sm:$0xff]  ;;  %v869_v39 = vpack.c.bf16 %v550_v38, %v549_v37 }
 0x13a   :  { %v193_v49 = vadd.f32 %v192_v48, %v117_v45  ;;  %v538_v45 = vld [vmem:[#allocation10 + $0x8] sm:$0xff]  ;;  %v567_v40 = vld [vmem:[#allocation10 + $0xf0] sm:$0xff] }
 0x13b   :  { %v197_v50 = vmin.f32 %v191_v47, 0.0  ;;  %vm195_vm1 = vcmp.gt.f32.partialorder %v191_v47, 0.0  ;;  %v845_v48 = vpack.c.bf16 %v538_v45, %v537_v42  ;;  %844 = vmatprep.subr.bf16.mxu1 %v843_v44  ;;  %v568_v42 = vld [vmem:[#allocation10 + $0xf8] sm:$0xff]  ;;  %v551_v45 = vld [vmem:[#allocation10 + $0x70] sm:$0xff] }
 0x13c   :  { %v198_v51 = vmin.f32 %v193_v49, 0.0  ;;  %vm196_vm2 = vcmp.gt.f32.partialorder %v193_v49, 0.0  ;;  %v871_v44 = vpack.c.bf16 %v568_v42, %v567_v40 }
 0x13d   :  { %v199_v52 = vmul.f32 1.442695, %v197_v50  ;;  %v275_v50 = vld [vmem:[%s1206_s4] sm:$0x3] }
 0x13e   :  { %v201_v53 = vmul.f32 1.442695, %v198_v51  ;;  %v280_v51 = vrot.slane %v275_v50, %v1168_v41 }
 0x13f   :  { %886 = vpow2.f32 %v199_v52  ;;  %v284_v52 = vrot.slane %v275_v50, %v1173_v43 }
 0x140   :  { %888 = vpow2.f32 %v201_v53 }
 0x149   :  { %v887_v54 = vpop.eup %886 }
 0x14a   :  { %v889_v55 = vpop.eup %888  ;;  %v665_v56 = vadd.f32 -1.0, %v887_v54 }
 0x14b   :  { %v666_v57 = vadd.f32 -1.0, %v889_v55 }
 0x14c   :  { %v205_v58 = vmul.f32 1.6732632, %v665_v56 }
 0x14d   :  { %v206_v59 = vmul.f32 1.6732632, %v666_v57 }
 0x14e   :  { %v207_v60 = vsel %vm195_vm1, %v191_v47, %v205_v58  ;;  %v556_v47 = vld [vmem:[#allocation10 + $0x98] sm:$0xff] }
 0x14f   :  { %v208_v61 = vsel %vm196_vm2, %v193_v49, %v206_v59  ;;  %v209_v63 = vmul.f32 1.050701, %v207_v60  ;;  %v847_v49 = vpack.c.bf16 %v556_v47, %v555_v46  ;;  %v552_v46 = vld [vmem:[#allocation10 + $0x78] sm:$0xff] }
 0x150   :  { %v210_v62 = vmul.f32 1.050701, %v208_v61  ;;  %v873_v47 = vpack.c.bf16 %v552_v46, %v551_v45 }
 0x152   :  { %351 = vmatprep.mubr.f32.mxu1 %v210_v62 }
 0x153   :  { %352 = vmatmul.mubr.f32.vlgmr.msra.gmra.mrb[0].mxu1 %v209_v63 }
 0x154   :  { %846 = vmatpush3.bf16.msra.mxu1 %v845_v48  ;;  %v438_v48 = vld [vmem:[%s1208_s6] sm:$0x3] }
 0x155   :  { %848 = vmatprep.subr.bf16.mxu1 %v847_v49  ;;  %v443_v49 = vrot.slane %v438_v48, %v1168_v41  ;;  %v447_v50 = vrot.slane %v438_v48, %v1173_v43 }
 0x158   :  { %850 = vmatpush3.bf16.msra.mxu1 %v849_v9 }
 0x159   :  { %852 = vmatprep.subr.bf16.mxu1 %v851_v12 }
 0x15c   :  { %854 = vmatpush3.bf16.msra.mxu1 %v853_v15 }
 0x15d   :  { %856 = vmatprep.subr.bf16.mxu1 %v855_v18 }
 0x160   :  { %858 = vmatpush3.bf16.msra.mxu1 %v857_v21 }
 0x161   :  { %860 = vmatprep.subr.bf16.mxu1 %v859_v24 }
 0x164   :  { %862 = vmatpush3.bf16.msra.mxu1 %v861_v27 }
 0x165   :  { %864 = vmatprep.subr.bf16.mxu1 %v863_v30 }
 0x168   :  { %866 = vmatpush3.bf16.msra.mxu1 %v865_v33 }
 0x169   :  { %868 = vmatprep.subr.bf16.mxu1 %v867_v36 }
 0x16c   :  { %870 = vmatpush3.bf16.msra.mxu1 %v869_v39 }
 0x16d   :  { %872 = vmatprep.subr.bf16.mxu1 %v871_v44 }
 0x170   :  { %874 = vmatpush3.bf16.msra.mxu1 %v873_v47 }
 0x226   :  { %v353_v53 = vpop.f32.mrb[0].mxu1 }
 0x227   :  { %v354_v54 = vadd.f32 %v353_v53, %v280_v51  ;;  %v355_v55 = vpop.f32.mrb[1].mxu1 }
 0x228   :  { %v356_v56 = vadd.f32 %v355_v55, %v284_v52 }
 0x229   :  { %v360_v57 = vmin.f32 %v354_v54, 0.0  ;;  %vm358_vm3 = vcmp.gt.f32.partialorder %v354_v54, 0.0 }
 0x22a   :  { %v361_v58 = vmin.f32 %v356_v56, 0.0  ;;  %vm359_vm4 = vcmp.gt.f32.partialorder %v356_v56, 0.0 }
 0x22b   :  { %v362_v59 = vmul.f32 1.442695, %v360_v57 }
 0x22c   :  { %v364_v60 = vmul.f32 1.442695, %v361_v58 }
 0x22d   :  { %890 = vpow2.f32 %v362_v59 }
 0x22e   :  { %892 = vpow2.f32 %v364_v60 }
 0x237   :  { %v891_v61 = vpop.eup %890 }
 0x238   :  { %v893_v62 = vpop.eup %892  ;;  %v667_v63 = vadd.f32 -1.0, %v891_v61 }
 0x239   :  { %v668_v0 = vadd.f32 -1.0, %v893_v62 }
 0x23a   :  { %v368_v1 = vmul.f32 1.6732632, %v667_v63 }
 0x23b   :  { %v369_v2 = vmul.f32 1.6732632, %v668_v0 }
 0x23c   :  { %v370_v3 = vsel %vm358_vm3, %v354_v54, %v368_v1 }
 0x23d   :  { %v371_v4 = vsel %vm359_vm4, %v356_v56, %v369_v2  ;;  %v372_v6 = vmul.f32 1.050701, %v370_v3 }
 0x23e   :  { %v373_v5 = vmul.f32 1.050701, %v371_v4  ;;  %v671_v4 = vld [vmem:[%s1210_s8] ss:$0 sm:$0xff] }
 0x240   :  { %514 = vmatprep.mubr.f32.mxu0 %v373_v5 }
 0x241   :  { %515 = vmatmul.mubr.f32.vlgmr.msra.gmra.mrb[2].mxu0 %v372_v6 }
 0x314   :  { %v516_v51 = vpop.f32.mrb[2].mxu0 }
 0x315   :  { %v517_v52 = vadd.f32 %v516_v51, %v443_v49  ;;  %v518_v53 = vpop.f32.mrb[3].mxu0 }
 0x316   :  { %v519_v54 = vadd.f32 %v518_v53, %v447_v50 }
 0x317   :  { %v523_v55 = vmin.f32 %v517_v52, 0.0  ;;  %vm521_vm5 = vcmp.gt.f32.partialorder %v517_v52, 0.0 }
 0x318   :  { %v524_v56 = vmin.f32 %v519_v54, 0.0  ;;  %vm522_vm6 = vcmp.gt.f32.partialorder %v519_v54, 0.0 }
 0x319   :  { %v525_v57 = vmul.f32 1.442695, %v523_v55 }
 0x31a   :  { %v527_v58 = vmul.f32 1.442695, %v524_v56 }
 0x31b   :  { %894 = vpow2.f32 %v525_v57 }
 0x31c   :  { %896 = vpow2.f32 %v527_v58 }
 0x325   :  { %v895_v59 = vpop.eup %894 }
 0x326   :  { %v897_v60 = vpop.eup %896  ;;  %v669_v61 = vadd.f32 -1.0, %v895_v59 }
 0x327   :  { %v670_v62 = vadd.f32 -1.0, %v897_v60 }
 0x328   :  { %v531_v63 = vmul.f32 1.6732632, %v669_v61 }
 0x329   :  { %v532_v0 = vmul.f32 1.6732632, %v670_v62 }
 0x32a   :  { %v533_v41 = vsel %vm521_vm5, %v517_v52, %v531_v63 }
 0x32b   :  { %v534_v43 = vsel %vm522_vm6, %v519_v54, %v532_v0  ;;  %v535_v2 = vmul.f32 1.050701, %v533_v41 }
 0x32c   :  { %v536_v1 = vmul.f32 1.050701, %v534_v43 }
 0x32e   :  { %640 = vmatprep.mubr.f32.mxu1 %v536_v1 }
 0x32f   :  { %641 = vmatmul.mubr.f32.vlgmr.msra.gmra.mrb[2].mxu1 %v535_v2 }
 0x402   :  { %v704_v3 = vpop.f32.mrb[2].mxu1 }
 0x403   :  { %v705_v5 = vpop.f32.mrb[3].mxu1 }
 0x404   :  { %v706_v6 = vadd.f32 %v705_v5, %v704_v3 }
 0x406   :  { %v643_v7 = vadd.f32 %v706_v6, %v671_v4 }
 0x408   :  { %646 = vst [vmem:[#allocation11] sm:$0xff] %v643_v7 }
 0x409   :  { %1019 = shalt.err (!%p1016_p2)
}
 0x40a   :  { %s1020_s15 = scalar_lea.hbm %s1211_s9, 128 }
 0x40b   :  { %p1021_p3 = scmp.ne.s32.totalorder %s1211_s9, %s1020_s15  ;;  %p1024_p4 = scmp.lt.u32.totalorder %s1020_s15, %s1211_s9 }
 0x40d   :  { %p1026_p5 = pnand %p1024_p4, %p1021_p3 }
 0x40f   :  { %1029 = shalt.err (!%p1026_p5)
}
 0x410   :  { %656 = dma.vmem_to_hbm [thread:$0]  %s654_s13, 128, %s1211_s9, [#allocation4]  }
 0x411   :  { %1036 = dma.done.wait [#allocation4], 128  }
 0x412   :  { %1037 = vsyncadd [#allocation4], 4294967168 }
 0x413   :  { %660 = vsyncpa [#allocation3], 1 }
 0x414   :  { %661 = vsyncpa [#allocation6], 1 }
 0x415   :  { %662 = vsyncpa [#allocation9], 1 }
 0x416   :  { %663 = vsyncpa [#allocation4], 1 }

// kernel: tpu_custom_call.1
= control target key start
LH: loop header
LB: loop body
LE: loop exit
PB: predicated region body
PF: predicated region fallthrough
CT: control target
= control target key end

     0   :  { %14 = vsyncpa [#allocation3], 0  ;;  %s1202_s0 = inlined_call_operand.hbm [shape: f32[8,32], index: 0, kind: input, shape index: {}]   ;;  %s1203_s1 = inlined_call_operand.hbm [shape: f32[32,256], index: 1, kind: input, shape index: {}]   ;;  %s1204_s2 = inlined_call_operand.vmem [shape: f32[1,256], index: 2, kind: input, shape index: {}]   ;;  %s1205_s3 = inlined_call_operand.hbm [shape: f32[256,256], index: 3, kind: input, shape index: {}]   ;;  %s1206_s4 = inlined_call_operand.vmem [shape: f32[1,256], index: 4, kind: input, shape index: {}]   ;;  %s1207_s5 = inlined_call_operand.hbm [shape: f32[256,256], index: 5, kind: input, shape index: {}]   ;;  %s1208_s6 = inlined_call_operand.vmem [shape: f32[1,256], index: 6, kind: input, shape index: {}]   ;;  %s1209_s7 = inlined_call_operand.hbm [shape: f32[256,128], index: 7, kind: input, shape index: {}]   ;;  %s1210_s8 = inlined_call_operand.vmem [shape: f32[1,128], index: 8, kind: input, shape index: {}]   ;;  %s1211_s9 = inlined_call_operand.hbm [shape: f32[8,128], index: 9, kind: output, shape index: {}]  }
   0x1   :  { %15 = vsyncpa [#allocation6], 0 }
   0x2   :  { %16 = vsyncpa [#allocation9], 0 }
   0x3   :  { %17 = vsyncpa [#allocation4], 0  ;;  %s1038_s30 = smov [#allocation5]   ;;  %s898_s13 = scalar_lea.hbm %s1203_s1, 1024 }
   0x4   :  { %s33_s10 = sshll.u32 %s1038_s30, 4  ;;  %p899_p0 = scmp.ne.s32.totalorder %s1203_s1, %s898_s13  ;;  %s34_s10 = int_to_ptr.vmem [resolvable:$true] %s33_s10 }
   0x5   :  { %p902_p1 = scmp.lt.u32.totalorder %s898_s13, %s1203_s1 }
   0x7   :  { %p904_p2 = pnand %p902_p1, %p899_p0 }
   0x9   :  { %907 = shalt.err (!%p904_p2)
}
   0xa   :  { %s908_s18 = scalar_lea.vmem %s34_s10, 1024  ;;  %p913_p4 = scmp.lt.s32.totalorder %s34_s10, %s34_s10 }
   0xb   :  { %p909_p3 = scmp.ne.s32.totalorder %s34_s10, %s908_s18  ;;  %p914_p5 = scmp.lt.s32.totalorder %s908_s18, %s908_s18 }
   0xd   :  { %p915_p6 = por %p914_p5, %p913_p4 }
   0xf   :  { %p916_p7 = pnand %p915_p6, %p909_p3 }
  0x11   :  { %919 = shalt.err (!%p916_p7)
}
  0x12   :  { %s1039_s19 = smov 256   ;;  %s1040_s20 = smov 16  }
  0x13   :  { %39 = dma.hbm_to_vmem [thread:$0]  %s1203_s1, 1024, %s34_s10, [#allocation6], %s1039_s19, %s1039_s19, %s1040_s20  }
  0x14   :  { %s1041_s23 = smov [#allocation8]   ;;  %s1042_s25 = smov [#allocation2]  }
  0x15   :  { %s61_s24 = sshll.u32 %s1041_s23, 4  ;;  %s24_s26 = sshll.u32 %s1042_s25, 4  ;;  %s62_s24 = int_to_ptr.vmem [resolvable:$true] %s61_s24  ;;  %s25_s26 = int_to_ptr.vmem [resolvable:$true] %s24_s26 }
  0x16   :  { %s920_s29 = scalar_lea.hbm %s1207_s5, 8192 }
  0x17   :  { %p921_p8 = scmp.ne.s32.totalorder %s1207_s5, %s920_s29  ;;  %p924_p9 = scmp.lt.u32.totalorder %s920_s29, %s1207_s5 }
  0x19   :  { %p926_p10 = pnand %p924_p9, %p921_p8 }
  0x1b   :  { %929 = shalt.err (!%p926_p10)
}
  0x1c   :  { %s930_s1 = scalar_lea.vmem %s62_s24, 8192  ;;  %p935_p12 = scmp.lt.s32.totalorder %s62_s24, %s62_s24 }
  0x1d   :  { %p931_p11 = scmp.ne.s32.totalorder %s62_s24, %s930_s1  ;;  %p936_p13 = scmp.lt.s32.totalorder %s930_s1, %s930_s1 }
  0x1f   :  { %p937_p0 = por %p936_p13, %p935_p12 }
  0x21   :  { %p938_p1 = pnand %p937_p0, %p931_p11 }
  0x23   :  { %941 = shalt.err (!%p938_p1)
}
  0x24   :  { %67 = dma.hbm_to_vmem [thread:$0]  %s1207_s5, 8192, %s62_s24, [#allocation9], %s1039_s19, %s1039_s19, %s1040_s20  }
  0x25   :  { %s942_s17 = scalar_lea.hbm %s1202_s0, 128 }
  0x26   :  { %p943_p2 = scmp.ne.s32.totalorder %s1202_s0, %s942_s17  ;;  %p946_p3 = scmp.lt.u32.totalorder %s942_s17, %s1202_s0 }
  0x28   :  { %p948_p4 = pnand %p946_p3, %p943_p2 }
  0x2a   :  { %951 = shalt.err (!%p948_p4)
}
  0x2b   :  { %s952_s25 = scalar_lea.vmem %s25_s26, 128  ;;  %p957_p6 = scmp.lt.s32.totalorder %s25_s26, %s25_s26 }
  0x2c   :  { %p953_p5 = scmp.ne.s32.totalorder %s25_s26, %s952_s25  ;;  %p958_p7 = scmp.lt.s32.totalorder %s952_s25, %s952_s25 }
  0x2e   :  { %p959_p8 = por %p958_p7, %p957_p6 }
  0x30   :  { %p960_p9 = pnand %p959_p8, %p953_p5 }
  0x32   :  { %963 = shalt.err (!%p960_p9)
}
  0x33   :  { %27 = dma.hbm_to_vmem [thread:$0]  %s1202_s0, 128, %s25_s26, [#allocation3]  }
  0x34   :  { %s1043_s27 = smov [#allocation7]   ;;  %s1044_s29 = smov [#allocation10]  }
  0x35   :  { %s47_s28 = sshll.u32 %s1043_s27, 4  ;;  %s75_s30 = sshll.u32 %s1044_s29, 4  ;;  %s48_s28 = int_to_ptr.vmem [resolvable:$true] %s47_s28  ;;  %s76_s30 = int_to_ptr.vmem [resolvable:$true] %s75_s30 }
  0x36   :  { %s964_s13 = scalar_lea.hbm %s1205_s3, 8192 }
  0x37   :  { %p965_p10 = scmp.ne.s32.totalorder %s1205_s3, %s964_s13  ;;  %p968_p11 = scmp.lt.u32.totalorder %s964_s13, %s1205_s3 }
  0x39   :  { %p970_p12 = pnand %p968_p11, %p965_p10 }
  0x3b   :  { %973 = shalt.err (!%p970_p12)
}
  0x3c   :  { %s974_s0 = scalar_lea.vmem %s48_s28, 8192  ;;  %p979_p0 = scmp.lt.s32.totalorder %s48_s28, %s48_s28 }
  0x3d   :  { %p975_p13 = scmp.ne.s32.totalorder %s48_s28, %s974_s0  ;;  %p980_p1 = scmp.lt.s32.totalorder %s974_s0, %s974_s0 }
  0x3f   :  { %p981_p2 = por %p980_p1, %p979_p0 }
  0x41   :  { %p982_p3 = pnand %p981_p2, %p975_p13 }
  0x43   :  { %985 = shalt.err (!%p982_p3)
}
  0x44   :  { %53 = dma.hbm_to_vmem [thread:$0]  %s1205_s3, 8192, %s48_s28, [#allocation6], %s1039_s19, %s1039_s19, %s1040_s20  }
  0x45   :  { %s986_s21 = scalar_lea.hbm %s1209_s7, 4096 }
  0x46   :  { %p987_p4 = scmp.ne.s32.totalorder %s1209_s7, %s986_s21  ;;  %p990_p5 = scmp.lt.u32.totalorder %s986_s21, %s1209_s7 }
  0x48   :  { %p992_p6 = pnand %p990_p5, %p987_p4 }
  0x4a   :  { %995 = shalt.err (!%p992_p6)
}
  0x4b   :  { %s996_s24 = scalar_lea.vmem %s76_s30, 4096  ;;  %p1001_p8 = scmp.lt.s32.totalorder %s76_s30, %s76_s30 }
  0x4c   :  { %p997_p7 = scmp.ne.s32.totalorder %s76_s30, %s996_s24  ;;  %p1002_p9 = scmp.lt.s32.totalorder %s996_s24, %s996_s24 }
  0x4e   :  { %p1003_p10 = por %p1002_p9, %p1001_p8 }
  0x50   :  { %p1004_p11 = pnand %p1003_p10, %p997_p7 }
  0x52   :  { %1007 = shalt.err (!%p1004_p11)
}
  0x53   :  { %s1045_s3 = smov 128   ;;  %s1046_s19 = smov 8  }
  0x54   :  { %81 = dma.hbm_to_vmem [thread:$0]  %s1209_s7, 4096, %s76_s30, [#allocation9], %s1045_s3, %s1045_s3, %s1046_s19  }
  0x55   :  { %1030 = dma.done.wait [#allocation3], 128  }
  0x56   :  { %1031 = vsyncadd [#allocation3], 4294967168 }
  0x57   :  { %1032 = dma.done.wait [#allocation6], 9216  }
  0x58   :  { %1033 = vsyncadd [#allocation6], 4294958080 }
  0x59   :  { %1034 = dma.done.wait [#allocation9], 12288  }
  0x5a   :  { %1035 = vsyncadd [#allocation9], 4294955008  ;;  %v1047_v0 = vmov 0.0   ;;  %v101_v1 = vld [vmem:[#allocation5 + $0x8] sm:$0xff]  ;;  %v103_v2 = vld [vmem:[#allocation5 + $0x18] sm:$0xff]  ;;  %vm120_vm0 = vcmask 261120  }
  0x5b   :  { %188 = vmatprep.mubr.f32.mxu0 %v1047_v0  ;;  %v100_v3 = vld [vmem:[#allocation5] sm:$0xff]  ;;  %v707_v4 = vpack.c.bf16 %v103_v2, %v101_v1  ;;  %v102_v5 = vld [vmem:[#allocation5 + $0x10] sm:$0xff]  ;;  %v105_v6 = vld [vmem:[#allocation5 + $0x28] sm:$0xff]  ;;  %s1048_s12 = smov [#allocation11]  }
  0x5c   :  { %v107_v7 = vld [vmem:[#allocation5 + $0x38] sm:$0xff]  ;;  %v709_v8 = vpack.c.bf16 %v102_v5, %v100_v3  ;;  %v104_v10 = vld [vmem:[#allocation5 + $0x20] sm:$0xff]  ;;  %v106_v11 = vld [vmem:[#allocation5 + $0x30] sm:$0xff]  ;;  %s653_s13 = sshll.u32 %s1048_s12, 4  ;;  %s654_s13 = int_to_ptr.vmem [resolvable:$true] %s653_s13 }
  0x5d   :  { %v711_v9 = vpack.c.bf16 %v107_v7, %v105_v6  ;;  %708 = vmatprep.subr.bf16.mxu0 %v707_v4  ;;  %v212_v12 = vld [vmem:[#allocation7 + $0x8] sm:$0xff]  ;;  %v214_v13 = vld [vmem:[#allocation7 + $0x18] sm:$0xff]  ;;  %v211_v14 = vld [vmem:[#allocation7] sm:$0xff]  ;;  %v713_v15 = vpack.c.bf16 %v106_v11, %v104_v10  ;;  %s1008_s1 = scalar_lea.vmem %s654_s13, 128  ;;  %p1013_p13 = scmp.lt.s32.totalorder %s654_s13, %s654_s13 }
  0x5e   :  { %710 = vmatpush1.bf16.msra.mxu0 %v709_v8  ;;  %v715_v16 = vpack.c.bf16 %v214_v13, %v212_v12  ;;  %v213_v17 = vld [vmem:[#allocation7 + $0x10] sm:$0xff]  ;;  %v216_v18 = vld [vmem:[#allocation7 + $0x28] sm:$0xff]  ;;  %v218_v19 = vld [vmem:[#allocation7 + $0x38] sm:$0xff]  ;;  %p1009_p12 = scmp.ne.s32.totalorder %s654_s13, %s1008_s1  ;;  %p1014_p0 = scmp.lt.s32.totalorder %s1008_s1, %s1008_s1 }
  0x5f   :  { %712 = vmatprep.subr.bf16.mxu0 %v711_v9  ;;  %v717_v20 = vpack.c.bf16 %v213_v17, %v211_v14  ;;  %v719_v21 = vpack.c.bf16 %v218_v19, %v216_v18  ;;  %v215_v22 = vld [vmem:[#allocation7 + $0x20] sm:$0xff]  ;;  %v217_v23 = vld [vmem:[#allocation7 + $0x30] sm:$0xff]  ;;  %v220_v24 = vld [vmem:[#allocation7 + $0x48] sm:$0xff] }
  0x60   :  { %716 = vmatprep.subr.bf16.mxu1 %v715_v16  ;;  %v222_v25 = vld [vmem:[#allocation7 + $0x58] sm:$0xff]  ;;  %v721_v26 = vpack.c.bf16 %v217_v23, %v215_v22  ;;  %v219_v29 = vld [vmem:[#allocation7 + $0x40] sm:$0xff]  ;;  %v221_v30 = vld [vmem:[#allocation7 + $0x50] sm:$0xff]  ;;  %p1015_p1 = por %p1014_p0, %p1013_p13 }
  0x61   :  { %718 = vmatpush1.bf16.msra.mxu1 %v717_v20  ;;  %v99_v27 = vld [vmem:[#allocation2] sm:$0xff]  ;;  %v723_v28 = vpack.c.bf16 %v222_v25, %v220_v24  ;;  %v224_v31 = vld [vmem:[#allocation7 + $0x68] sm:$0xff]  ;;  %v725_v33 = vpack.c.bf16 %v221_v30, %v219_v29  ;;  %v223_v35 = vld [vmem:[#allocation7 + $0x60] sm:$0xff] }
  0x62   :  { %714 = vmatpush1.bf16.msra.mxu0 %v713_v15  ;;  %720 = vmatprep.subr.bf16.mxu1 %v719_v21  ;;  %v226_v32 = vld [vmem:[#allocation7 + $0x78] sm:$0xff]  ;;  %v225_v36 = vld [vmem:[#allocation7 + $0x70] sm:$0xff]  ;;  %v228_v37 = vld [vmem:[#allocation7 + $0x88] sm:$0xff]  ;;  %p1016_p2 = pnand %p1015_p1, %p1009_p12 }
  0x63   :  { %v727_v34 = vpack.c.bf16 %v226_v32, %v224_v31  ;;  %v230_v38 = vld [vmem:[#allocation7 + $0x98] sm:$0xff]  ;;  %v729_v39 = vpack.c.bf16 %v225_v36, %v223_v35  ;;  %v227_v41 = vld [vmem:[#allocation7 + $0x80] sm:$0xff]  ;;  %v229_v42 = vld [vmem:[#allocation7 + $0x90] sm:$0xff] }
  0x64   :  { %v731_v40 = vpack.c.bf16 %v230_v38, %v228_v37  ;;  %v232_v43 = vld [vmem:[#allocation7 + $0xa8] sm:$0xff]  ;;  %v234_v44 = vld [vmem:[#allocation7 + $0xb8] sm:$0xff]  ;;  %v733_v45 = vpack.c.bf16 %v229_v42, %v227_v41  ;;  %v231_v47 = vld [vmem:[#allocation7 + $0xa0] sm:$0xff] }
  0x65   :  { %664 = vmatmul.mubr.msk.f32.vlgmr.msra.gmra.mrb[0].mxu0 %vm120_vm0, %v99_v27  ;;  %722 = vmatpush1.bf16.msra.mxu1 %v721_v26  ;;  %v735_v46 = vpack.c.bf16 %v234_v44, %v232_v43  ;;  %v233_v48 = vld [vmem:[#allocation7 + $0xb0] sm:$0xff]  ;;  %v236_v49 = vld [vmem:[#allocation7 + $0xc8] sm:$0xff]  ;;  %v238_v50 = vld [vmem:[#allocation7 + $0xd8] sm:$0xff] }
  0x66   :  { %724 = vmatprep.subr.bf16.mxu1 %v723_v28  ;;  %v737_v51 = vpack.c.bf16 %v233_v48, %v231_v47  ;;  %v739_v52 = vpack.c.bf16 %v238_v50, %v236_v49  ;;  %v235_v53 = vld [vmem:[#allocation7 + $0xc0] sm:$0xff]  ;;  %v237_v54 = vld [vmem:[#allocation7 + $0xd0] sm:$0xff]  ;;  %v240_v55 = vld [vmem:[#allocation7 + $0xe8] sm:$0xff] }
  0x67   :  { %v242_v56 = vld [vmem:[#allocation7 + $0xf8] sm:$0xff]  ;;  %v741_v57 = vpack.c.bf16 %v237_v54, %v235_v53  ;;  %v239_v59 = vld [vmem:[#allocation7 + $0xe0] sm:$0xff]  ;;  %v241_v60 = vld [vmem:[#allocation7 + $0xf0] sm:$0xff] }
  0x68   :  { %v743_v58 = vpack.c.bf16 %v242_v56, %v240_v55  ;;  %v244_v61 = vld [vmem:[#allocation7 + $0x108] sm:$0xff]  ;;  %v246_v62 = vld [vmem:[#allocation7 + $0x118] sm:$0xff]  ;;  %v745_v63 = vpack.c.bf16 %v241_v60, %v239_v59  ;;  %v243_v1 = vld [vmem:[#allocation7 + $0x100] sm:$0xff] }
  0x69   :  { %726 = vmatpush1.bf16.msra.mxu1 %v725_v33  ;;  %v747_v0 = vpack.c.bf16 %v246_v62, %v244_v61  ;;  %v245_v2 = vld [vmem:[#allocation7 + $0x110] sm:$0xff]  ;;  %v248_v3 = vld [vmem:[#allocation7 + $0x128] sm:$0xff]  ;;  %v250_v4 = vld [vmem:[#allocation7 + $0x138] sm:$0xff] }
  0x6a   :  { %728 = vmatprep.subr.bf16.mxu1 %v727_v34  ;;  %v749_v5 = vpack.c.bf16 %v245_v2, %v243_v1  ;;  %v751_v6 = vpack.c.bf16 %v250_v4, %v248_v3  ;;  %v247_v7 = vld [vmem:[#allocation7 + $0x120] sm:$0xff]  ;;  %v249_v8 = vld [vmem:[#allocation7 + $0x130] sm:$0xff]  ;;  %v252_v10 = vld [vmem:[#allocation7 + $0x148] sm:$0xff] }
  0x6b   :  { %v753_v9 = vpack.c.bf16 %v249_v8, %v247_v7  ;;  %v254_v11 = vld [vmem:[#allocation7 + $0x158] sm:$0xff]  ;;  %v251_v13 = vld [vmem:[#allocation7 + $0x140] sm:$0xff]  ;;  %v253_v14 = vld [vmem:[#allocation7 + $0x150] sm:$0xff] }
  0x6c   :  { %v755_v12 = vpack.c.bf16 %v254_v11, %v252_v10  ;;  %v757_v15 = vpack.c.bf16 %v253_v14, %v251_v13  ;;  %v256_v16 = vld [vmem:[#allocation7 + $0x168] sm:$0xff]  ;;  %v258_v17 = vld [vmem:[#allocation7 + $0x178] sm:$0xff]  ;;  %v255_v19 = vld [vmem:[#allocation7 + $0x160] sm:$0xff] }
  0x6d   :  { %730 = vmatpush1.bf16.msra.mxu1 %v729_v39  ;;  %v759_v18 = vpack.c.bf16 %v258_v17, %v256_v16  ;;  %v257_v20 = vld [vmem:[#allocation7 + $0x170] sm:$0xff]  ;;  %v260_v22 = vld [vmem:[#allocation7 + $0x188] sm:$0xff]  ;;  %v262_v23 = vld [vmem:[#allocation7 + $0x198] sm:$0xff] }
  0x6e   :  { %732 = vmatprep.subr.bf16.mxu1 %v731_v40  ;;  %v761_v21 = vpack.c.bf16 %v257_v20, %v255_v19  ;;  %v763_v24 = vpack.c.bf16 %v262_v23, %v260_v22  ;;  %v259_v25 = vld [vmem:[#allocation7 + $0x180] sm:$0xff]  ;;  %v261_v26 = vld [vmem:[#allocation7 + $0x190] sm:$0xff]  ;;  %v264_v28 = vld [vmem:[#allocation7 + $0x1a8] sm:$0xff] }
  0x6f   :  { %v765_v27 = vpack.c.bf16 %v261_v26, %v259_v25  ;;  %v266_v29 = vld [vmem:[#allocation7 + $0x1b8] sm:$0xff]  ;;  %v263_v31 = vld [vmem:[#allocation7 + $0x1a0] sm:$0xff]  ;;  %v265_v32 = vld [vmem:[#allocation7 + $0x1b0] sm:$0xff] }
  0x70   :  { %v767_v30 = vpack.c.bf16 %v266_v29, %v264_v28  ;;  %v769_v33 = vpack.c.bf16 %v265_v32, %v263_v31  ;;  %v268_v34 = vld [vmem:[#allocation7 + $0x1c8] sm:$0xff]  ;;  %v270_v35 = vld [vmem:[#allocation7 + $0x1d8] sm:$0xff]  ;;  %v267_v37 = vld [vmem:[#allocation7 + $0x1c0] sm:$0xff] }
  0x71   :  { %734 = vmatpush1.bf16.msra.mxu1 %v733_v45  ;;  %v771_v36 = vpack.c.bf16 %v270_v35, %v268_v34  ;;  %v269_v38 = vld [vmem:[#allocation7 + $0x1d0] sm:$0xff]  ;;  %v272_v40 = vld [vmem:[#allocation7 + $0x1e8] sm:$0xff]  ;;  %v274_v41 = vld [vmem:[#allocation7 + $0x1f8] sm:$0xff] }
  0x72   :  { %736 = vmatprep.subr.bf16.mxu1 %v735_v46  ;;  %v773_v39 = vpack.c.bf16 %v269_v38, %v267_v37  ;;  %v271_v42 = vld [vmem:[#allocation7 + $0x1e0] sm:$0xff]  ;;  %v775_v43 = vpack.c.bf16 %v274_v41, %v272_v40  ;;  %v273_v44 = vld [vmem:[#allocation7 + $0x1f0] sm:$0xff]  ;;  %v375_v46 = vld [vmem:[#allocation8 + $0x8] sm:$0xff] }
  0x73   :  { %v777_v45 = vpack.c.bf16 %v273_v44, %v271_v42  ;;  %v377_v47 = vld [vmem:[#allocation8 + $0x18] sm:$0xff]  ;;  %v374_v48 = vld [vmem:[#allocation8] sm:$0xff]  ;;  %v376_v50 = vld [vmem:[#allocation8 + $0x10] sm:$0xff] }
  0x74   :  { %v779_v49 = vpack.c.bf16 %v377_v47, %v375_v46  ;;  %v781_v53 = vpack.c.bf16 %v376_v50, %v374_v48  ;;  %v378_v55 = vld [vmem:[#allocation8 + $0x20] sm:$0xff]  ;;  %v380_v56 = vld [vmem:[#allocation8 + $0x30] sm:$0xff]  ;;  %v395_v11 = vld [vmem:[#allocation8 + $0xa8] sm:$0xff] }
  0x75   :  { %738 = vmatpush1.bf16.msra.mxu1 %v737_v51  ;;  %v379_v51 = vld [vmem:[#allocation8 + $0x28] sm:$0xff]  ;;  %v785_v59 = vpack.c.bf16 %v380_v56, %v378_v55  ;;  %v382_v61 = vld [vmem:[#allocation8 + $0x40] sm:$0xff]  ;;  %v384_v62 = vld [vmem:[#allocation8 + $0x50] sm:$0xff] }
  0x76   :  { %740 = vmatprep.subr.bf16.mxu1 %v739_v52  ;;  %v381_v52 = vld [vmem:[#allocation8 + $0x38] sm:$0xff]  ;;  %780 = vmatprep.subr.bf16.mxu0 %v779_v49  ;;  %v789_v1 = vpack.c.bf16 %v384_v62, %v382_v61  ;;  %v386_v3 = vld [vmem:[#allocation8 + $0x60] sm:$0xff]  ;;  %v388_v4 = vld [vmem:[#allocation8 + $0x70] sm:$0xff] }
  0x77   :  { %v783_v54 = vpack.c.bf16 %v381_v52, %v379_v51  ;;  %782 = vmatpush1.bf16.msra.mxu0 %v781_v53  ;;  %v793_v7 = vpack.c.bf16 %v388_v4, %v386_v3  ;;  %v392_v10 = vld [vmem:[#allocation8 + $0x90] sm:$0xff]  ;;  %v399_v17 = vld [vmem:[#allocation8 + $0xc8] sm:$0xff]  ;;  %v108_v42 = vld [vmem:[%s1204_s2] sm:$0x3] }
  0x78   :  { %v396_v16 = vld [vmem:[#allocation8 + $0xb0] sm:$0xff]  ;;  %v403_v23 = vld [vmem:[#allocation8 + $0xe8] sm:$0xff]  ;;  %v417_v4 = vld [vmem:[#allocation8 + $0x158] sm:$0xff] }
  0x79   :  { %742 = vmatpush1.bf16.msra.mxu1 %v741_v57  ;;  %v383_v57 = vld [vmem:[#allocation8 + $0x48] sm:$0xff]  ;;  %784 = vmatprep.subr.bf16.mxu0 %v783_v54  ;;  %v400_v22 = vld [vmem:[#allocation8 + $0xd0] sm:$0xff] }
  0x7a   :  { %744 = vmatprep.subr.bf16.mxu1 %v743_v58  ;;  %v385_v58 = vld [vmem:[#allocation8 + $0x58] sm:$0xff]  ;;  %v404_v28 = vld [vmem:[#allocation8 + $0xf0] sm:$0xff]  ;;  %v407_v29 = vld [vmem:[#allocation8 + $0x108] sm:$0xff] }
  0x7b   :  { %v787_v60 = vpack.c.bf16 %v385_v58, %v383_v57  ;;  %786 = vmatpush1.bf16.msra.mxu0 %v785_v59  ;;  %v408_v34 = vld [vmem:[#allocation8 + $0x110] sm:$0xff]  ;;  %v411_v35 = vld [vmem:[#allocation8 + $0x128] sm:$0xff] }
  0x7c   :  { %v415_v3 = vld [vmem:[#allocation8 + $0x148] sm:$0xff] }
  0x7d   :  { %746 = vmatpush1.bf16.msra.mxu1 %v745_v63  ;;  %v387_v63 = vld [vmem:[#allocation8 + $0x68] sm:$0xff]  ;;  %788 = vmatprep.subr.bf16.mxu0 %v787_v60 }
  0x7e   :  { %748 = vmatprep.subr.bf16.mxu1 %v747_v0  ;;  %v389_v0 = vld [vmem:[#allocation8 + $0x78] sm:$0xff] }
  0x7f   :  { %v791_v2 = vpack.c.bf16 %v389_v0, %v387_v63  ;;  %790 = vmatpush1.bf16.msra.mxu0 %v789_v1  ;;  %v410_v0 = vld [vmem:[#allocation8 + $0x120] sm:$0xff]  ;;  %v412_v1 = vld [vmem:[#allocation8 + $0x130] sm:$0xff] }
  0x81   :  { %750 = vmatpush1.bf16.msra.mxu1 %v749_v5  ;;  %v391_v5 = vld [vmem:[#allocation8 + $0x88] sm:$0xff]  ;;  %792 = vmatprep.subr.bf16.mxu0 %v791_v2  ;;  %v817_v2 = vpack.c.bf16 %v412_v1, %v410_v0 }
  0x82   :  { %752 = vmatprep.subr.bf16.mxu1 %v751_v6  ;;  %v393_v6 = vld [vmem:[#allocation8 + $0x98] sm:$0xff] }
  0x83   :  { %v795_v8 = vpack.c.bf16 %v393_v6, %v391_v5  ;;  %794 = vmatpush1.bf16.msra.mxu0 %v793_v7  ;;  %v819_v5 = vpack.c.bf16 %v417_v4, %v415_v3  ;;  %v414_v6 = vld [vmem:[#allocation8 + $0x140] sm:$0xff]  ;;  %v416_v7 = vld [vmem:[#allocation8 + $0x150] sm:$0xff] }
  0x85   :  { %754 = vmatpush1.bf16.msra.mxu1 %v753_v9  ;;  %v390_v9 = vld [vmem:[#allocation8 + $0x80] sm:$0xff]  ;;  %796 = vmatprep.subr.bf16.mxu0 %v795_v8  ;;  %v821_v8 = vpack.c.bf16 %v416_v7, %v414_v6  ;;  %v539_v7 = vld [vmem:[#allocation10 + $0x10] sm:$0xff] }
  0x86   :  { %756 = vmatprep.subr.bf16.mxu1 %v755_v12  ;;  %v397_v12 = vld [vmem:[#allocation8 + $0xb8] sm:$0xff]  ;;  %v797_v13 = vpack.c.bf16 %v392_v10, %v390_v9  ;;  %v419_v9 = vld [vmem:[#allocation8 + $0x168] sm:$0xff] }
  0x87   :  { %v799_v14 = vpack.c.bf16 %v397_v12, %v395_v11  ;;  %v421_v10 = vld [vmem:[#allocation8 + $0x178] sm:$0xff]  ;;  %v418_v12 = vld [vmem:[#allocation8 + $0x160] sm:$0xff] }
  0x88   :  { %798 = vmatpush1.bf16.msra.mxu0 %v797_v13  ;;  %v823_v11 = vpack.c.bf16 %v421_v10, %v419_v9  ;;  %v420_v13 = vld [vmem:[#allocation8 + $0x170] sm:$0xff]  ;;  %v557_v10 = vld [vmem:[#allocation10 + $0xa0] sm:$0xff] }
  0x89   :  { %758 = vmatpush1.bf16.msra.mxu1 %v757_v15  ;;  %v394_v15 = vld [vmem:[#allocation8 + $0xa0] sm:$0xff]  ;;  %800 = vmatprep.subr.bf16.mxu0 %v799_v14  ;;  %v825_v14 = vpack.c.bf16 %v420_v13, %v418_v12 }
  0x8a   :  { %760 = vmatprep.subr.bf16.mxu1 %v759_v18  ;;  %v401_v18 = vld [vmem:[#allocation8 + $0xd8] sm:$0xff]  ;;  %v801_v19 = vpack.c.bf16 %v396_v16, %v394_v15  ;;  %v423_v15 = vld [vmem:[#allocation8 + $0x188] sm:$0xff]  ;;  %v541_v13 = vld [vmem:[#allocation10 + $0x20] sm:$0xff] }
  0x8b   :  { %v803_v20 = vpack.c.bf16 %v401_v18, %v399_v17  ;;  %v425_v16 = vld [vmem:[#allocation8 + $0x198] sm:$0xff]  ;;  %v422_v18 = vld [vmem:[#allocation8 + $0x180] sm:$0xff] }
  0x8c   :  { %802 = vmatpush1.bf16.msra.mxu0 %v801_v19  ;;  %v827_v17 = vpack.c.bf16 %v425_v16, %v423_v15  ;;  %v424_v19 = vld [vmem:[#allocation8 + $0x190] sm:$0xff] }
  0x8d   :  { %762 = vmatpush1.bf16.msra.mxu1 %v761_v21  ;;  %v398_v21 = vld [vmem:[#allocation8 + $0xc0] sm:$0xff]  ;;  %804 = vmatprep.subr.bf16.mxu0 %v803_v20  ;;  %v829_v20 = vpack.c.bf16 %v424_v19, %v422_v18  ;;  %v559_v16 = vld [vmem:[#allocation10 + $0xb0] sm:$0xff] }
  0x8e   :  { %764 = vmatprep.subr.bf16.mxu1 %v763_v24  ;;  %v405_v24 = vld [vmem:[#allocation8 + $0xf8] sm:$0xff]  ;;  %v805_v25 = vpack.c.bf16 %v400_v22, %v398_v21  ;;  %v427_v21 = vld [vmem:[#allocation8 + $0x1a8] sm:$0xff]  ;;  %v543_v19 = vld [vmem:[#allocation10 + $0x30] sm:$0xff] }
  0x8f   :  { %v807_v26 = vpack.c.bf16 %v405_v24, %v403_v23  ;;  %v429_v22 = vld [vmem:[#allocation8 + $0x1b8] sm:$0xff]  ;;  %v426_v24 = vld [vmem:[#allocation8 + $0x1a0] sm:$0xff] }
  0x90   :  { %806 = vmatpush1.bf16.msra.mxu0 %v805_v25  ;;  %v831_v23 = vpack.c.bf16 %v429_v22, %v427_v21  ;;  %v428_v25 = vld [vmem:[#allocation8 + $0x1b0] sm:$0xff]  ;;  %v561_v22 = vld [vmem:[#allocation10 + $0xc0] sm:$0xff] }
  0x91   :  { %766 = vmatpush1.bf16.msra.mxu1 %v765_v27  ;;  %v402_v27 = vld [vmem:[#allocation8 + $0xe0] sm:$0xff]  ;;  %808 = vmatprep.subr.bf16.mxu0 %v807_v26  ;;  %v833_v26 = vpack.c.bf16 %v428_v25, %v426_v24 }
  0x92   :  { %768 = vmatprep.subr.bf16.mxu1 %v767_v30  ;;  %v409_v30 = vld [vmem:[#allocation8 + $0x118] sm:$0xff]  ;;  %v809_v31 = vpack.c.bf16 %v404_v28, %v402_v27  ;;  %v431_v27 = vld [vmem:[#allocation8 + $0x1c8] sm:$0xff]  ;;  %v545_v25 = vld [vmem:[#allocation10 + $0x40] sm:$0xff] }
  0x93   :  { %v811_v32 = vpack.c.bf16 %v409_v30, %v407_v29  ;;  %v433_v28 = vld [vmem:[#allocation8 + $0x1d8] sm:$0xff]  ;;  %v430_v30 = vld [vmem:[#allocation8 + $0x1c0] sm:$0xff] }
  0x94   :  { %810 = vmatpush1.bf16.msra.mxu0 %v809_v31  ;;  %v835_v29 = vpack.c.bf16 %v433_v28, %v431_v27  ;;  %v432_v31 = vld [vmem:[#allocation8 + $0x1d0] sm:$0xff] }
  0x95   :  { %770 = vmatpush1.bf16.msra.mxu1 %v769_v33  ;;  %v406_v33 = vld [vmem:[#allocation8 + $0x100] sm:$0xff]  ;;  %812 = vmatprep.subr.bf16.mxu0 %v811_v32  ;;  %v837_v32 = vpack.c.bf16 %v432_v31, %v430_v30  ;;  %v563_v28 = vld [vmem:[#allocation10 + $0xd0] sm:$0xff] }
  0x96   :  { %772 = vmatprep.subr.bf16.mxu1 %v771_v36  ;;  %v413_v36 = vld [vmem:[#allocation8 + $0x138] sm:$0xff]  ;;  %v813_v37 = vpack.c.bf16 %v408_v34, %v406_v33  ;;  %v435_v33 = vld [vmem:[#allocation8 + $0x1e8] sm:$0xff]  ;;  %v547_v31 = vld [vmem:[#allocation10 + $0x50] sm:$0xff] }
  0x97   :  { %v815_v38 = vpack.c.bf16 %v413_v36, %v411_v35  ;;  %v437_v34 = vld [vmem:[#allocation8 + $0x1f8] sm:$0xff]  ;;  %v434_v36 = vld [vmem:[#allocation8 + $0x1e0] sm:$0xff] }
  0x98   :  { %814 = vmatpush1.bf16.msra.mxu0 %v813_v37  ;;  %v839_v35 = vpack.c.bf16 %v437_v34, %v435_v33  ;;  %v436_v37 = vld [vmem:[#allocation8 + $0x1f0] sm:$0xff]  ;;  %v565_v34 = vld [vmem:[#allocation10 + $0xe0] sm:$0xff] }
  0x99   :  { %774 = vmatpush1.bf16.msra.mxu1 %v773_v39  ;;  %816 = vmatprep.subr.bf16.mxu0 %v815_v38  ;;  %v110_v39 = vlaneseq  ;;  %v841_v38 = vpack.c.bf16 %v436_v37, %v434_v36  ;;  %v549_v37 = vld [vmem:[#allocation10 + $0x60] sm:$0xff] }
  0x9a   :  { %776 = vmatprep.subr.bf16.mxu1 %v775_v43 }
  0x9b   :  { %v111_v40 = vshrl.u32 %v110_v39, 7  ;;  %v553_v39 = vld [vmem:[#allocation10 + $0x80] sm:$0xff] }
  0x9c   :  { %818 = vmatpush1.bf16.msra.mxu0 %v817_v2 }
  0x9d   :  { %778 = vmatpush1.bf16.msra.mxu1 %v777_v45  ;;  %v1168_v41 = vsub.s32 0, %v111_v40  ;;  %v1173_v43 = vsub.s32 1, %v111_v40  ;;  %820 = vmatprep.subr.bf16.mxu0 %v819_v5  ;;  %v554_v40 = vld [vmem:[#allocation10 + $0x88] sm:$0xff] }
  0x9f   :  { %v113_v44 = vrot.slane %v108_v42, %v1168_v41  ;;  %v117_v45 = vrot.slane %v108_v42, %v1173_v43  ;;  %v537_v42 = vld [vmem:[#allocation10] sm:$0xff] }
  0xa0   :  { %822 = vmatpush1.bf16.msra.mxu0 %v821_v8  ;;  %v540_v8 = vld [vmem:[#allocation10 + $0x18] sm:$0xff] }
  0xa1   :  { %824 = vmatprep.subr.bf16.mxu0 %v823_v11  ;;  %v849_v9 = vpack.c.bf16 %v540_v8, %v539_v7  ;;  %v558_v11 = vld [vmem:[#allocation10 + $0xa8] sm:$0xff] }
  0xa2   :  { %v851_v12 = vpack.c.bf16 %v558_v11, %v557_v10 }
  0xa4   :  { %826 = vmatpush1.bf16.msra.mxu0 %v825_v14  ;;  %v542_v14 = vld [vmem:[#allocation10 + $0x28] sm:$0xff] }
  0xa5   :  { %828 = vmatprep.subr.bf16.mxu0 %v827_v17  ;;  %v853_v15 = vpack.c.bf16 %v542_v14, %v541_v13  ;;  %v560_v17 = vld [vmem:[#allocation10 + $0xb8] sm:$0xff] }
  0xa6   :  { %v855_v18 = vpack.c.bf16 %v560_v17, %v559_v16 }
  0xa8   :  { %830 = vmatpush1.bf16.msra.mxu0 %v829_v20  ;;  %v544_v20 = vld [vmem:[#allocation10 + $0x38] sm:$0xff] }
  0xa9   :  { %832 = vmatprep.subr.bf16.mxu0 %v831_v23  ;;  %v857_v21 = vpack.c.bf16 %v544_v20, %v543_v19  ;;  %v562_v23 = vld [vmem:[#allocation10 + $0xc8] sm:$0xff] }
  0xaa   :  { %v859_v24 = vpack.c.bf16 %v562_v23, %v561_v22 }
  0xac   :  { %834 = vmatpush1.bf16.msra.mxu0 %v833_v26  ;;  %v546_v26 = vld [vmem:[#allocation10 + $0x48] sm:$0xff] }
  0xad   :  { %836 = vmatprep.subr.bf16.mxu0 %v835_v29  ;;  %v861_v27 = vpack.c.bf16 %v546_v26, %v545_v25  ;;  %v564_v29 = vld [vmem:[#allocation10 + $0xd8] sm:$0xff] }
  0xae   :  { %v863_v30 = vpack.c.bf16 %v564_v29, %v563_v28 }
  0xb0   :  { %838 = vmatpush1.bf16.msra.mxu0 %v837_v32  ;;  %v548_v32 = vld [vmem:[#allocation10 + $0x58] sm:$0xff] }
  0xb1   :  { %840 = vmatprep.subr.bf16.mxu0 %v839_v35  ;;  %v865_v33 = vpack.c.bf16 %v548_v32, %v547_v31  ;;  %v566_v35 = vld [vmem:[#allocation10 + $0xe8] sm:$0xff] }
  0xb2   :  { %v867_v36 = vpack.c.bf16 %v566_v35, %v565_v34 }
  0xb4   :  { %842 = vmatpush1.bf16.msra.mxu0 %v841_v38  ;;  %v550_v38 = vld [vmem:[#allocation10 + $0x68] sm:$0xff] }
 0x138   :  { %v190_v46 = vpop.f32.mrb[0].mxu0 }
 0x139   :  { %v191_v47 = vadd.f32 %v190_v46, %v113_v44  ;;  %v192_v48 = vpop.f32.mrb[1].mxu0  ;;  %v843_v44 = vpack.c.bf16 %v554_v40, %v553_v39  ;;  %v555_v46 = vld [vmem:[#allocation10 + $0x90] sm:$0xff]  ;;  %v869_v39 = vpack.c.bf16 %v550_v38, %v549_v37 }
 0x13a   :  { %v193_v49 = vadd.f32 %v192_v48, %v117_v45  ;;  %v538_v45 = vld [vmem:[#allocation10 + $0x8] sm:$0xff]  ;;  %v567_v40 = vld [vmem:[#allocation10 + $0xf0] sm:$0xff] }
 0x13b   :  { %v197_v50 = vmin.f32 %v191_v47, 0.0  ;;  %vm195_vm1 = vcmp.gt.f32.partialorder %v191_v47, 0.0  ;;  %v845_v48 = vpack.c.bf16 %v538_v45, %v537_v42  ;;  %844 = vmatprep.subr.bf16.mxu1 %v843_v44  ;;  %v568_v42 = vld [vmem:[#allocation10 + $0xf8] sm:$0xff]  ;;  %v551_v45 = vld [vmem:[#allocation10 + $0x70] sm:$0xff] }
 0x13c   :  { %v198_v51 = vmin.f32 %v193_v49, 0.0  ;;  %vm196_vm2 = vcmp.gt.f32.partialorder %v193_v49, 0.0  ;;  %v871_v44 = vpack.c.bf16 %v568_v42, %v567_v40 }
 0x13d   :  { %v199_v52 = vmul.f32 1.442695, %v197_v50  ;;  %v275_v50 = vld [vmem:[%s1206_s4] sm:$0x3] }
 0x13e   :  { %v201_v53 = vmul.f32 1.442695, %v198_v51  ;;  %v280_v51 = vrot.slane %v275_v50, %v1168_v41 }
 0x13f   :  { %886 = vpow2.f32 %v199_v52  ;;  %v284_v52 = vrot.slane %v275_v50, %v1173_v43 }
 0x140   :  { %888 = vpow2.f32 %v201_v53 }
 0x149   :  { %v887_v54 = vpop.eup %886 }
 0x14a   :  { %v889_v55 = vpop.eup %888  ;;  %v665_v56 = vadd.f32 -1.0, %v887_v54 }
 0x14b   :  { %v666_v57 = vadd.f32 -1.0, %v889_v55 }
 0x14c   :  { %v205_v58 = vmul.f32 1.6732632, %v665_v56 }
 0x14d   :  { %v206_v59 = vmul.f32 1.6732632, %v666_v57 }
 0x14e   :  { %v207_v60 = vsel %vm195_vm1, %v191_v47, %v205_v58  ;;  %v556_v47 = vld [vmem:[#allocation10 + $0x98] sm:$0xff] }
 0x14f   :  { %v208_v61 = vsel %vm196_vm2, %v193_v49, %v206_v59  ;;  %v209_v63 = vmul.f32 1.050701, %v207_v60  ;;  %v847_v49 = vpack.c.bf16 %v556_v47, %v555_v46  ;;  %v552_v46 = vld [vmem:[#allocation10 + $0x78] sm:$0xff] }
 0x150   :  { %v210_v62 = vmul.f32 1.050701, %v208_v61  ;;  %v873_v47 = vpack.c.bf16 %v552_v46, %v551_v45 }
 0x152   :  { %351 = vmatprep.mubr.f32.mxu1 %v210_v62 }
 0x153   :  { %352 = vmatmul.mubr.f32.vlgmr.msra.gmra.mrb[0].mxu1 %v209_v63 }
 0x154   :  { %846 = vmatpush3.bf16.msra.mxu1 %v845_v48  ;;  %v438_v48 = vld [vmem:[%s1208_s6] sm:$0x3] }
 0x155   :  { %848 = vmatprep.subr.bf16.mxu1 %v847_v49  ;;  %v443_v49 = vrot.slane %v438_v48, %v1168_v41  ;;  %v447_v50 = vrot.slane %v438_v48, %v1173_v43 }
 0x158   :  { %850 = vmatpush3.bf16.msra.mxu1 %v849_v9 }
 0x159   :  { %852 = vmatprep.subr.bf16.mxu1 %v851_v12 }
 0x15c   :  { %854 = vmatpush3.bf16.msra.mxu1 %v853_v15 }
 0x15d   :  { %856 = vmatprep.subr.bf16.mxu1 %v855_v18 }
 0x160   :  { %858 = vmatpush3.bf16.msra.mxu1 %v857_v21 }
 0x161   :  { %860 = vmatprep.subr.bf16.mxu1 %v859_v24 }
 0x164   :  { %862 = vmatpush3.bf16.msra.mxu1 %v861_v27 }
 0x165   :  { %864 = vmatprep.subr.bf16.mxu1 %v863_v30 }
 0x168   :  { %866 = vmatpush3.bf16.msra.mxu1 %v865_v33 }
 0x169   :  { %868 = vmatprep.subr.bf16.mxu1 %v867_v36 }
 0x16c   :  { %870 = vmatpush3.bf16.msra.mxu1 %v869_v39 }
 0x16d   :  { %872 = vmatprep.subr.bf16.mxu1 %v871_v44 }
 0x170   :  { %874 = vmatpush3.bf16.msra.mxu1 %v873_v47 }
 0x226   :  { %v353_v53 = vpop.f32.mrb[0].mxu1 }
 0x227   :  { %v354_v54 = vadd.f32 %v353_v53, %v280_v51  ;;  %v355_v55 = vpop.f32.mrb[1].mxu1 }
 0x228   :  { %v356_v56 = vadd.f32 %v355_v55, %v284_v52 }
 0x229   :  { %v360_v57 = vmin.f32 %v354_v54, 0.0  ;;  %vm358_vm3 = vcmp.gt.f32.partialorder %v354_v54, 0.0 }
 0x22a   :  { %v361_v58 = vmin.f32 %v356_v56, 0.0  ;;  %vm359_vm4 = vcmp.gt.f32.partialorder %v356_v56, 0.0 }
 0x22b   :  { %v362_v59 = vmul.f32 1.442695, %v360_v57 }
 0x22c   :  { %v364_v60 = vmul.f32 1.442695, %v361_v58 }
 0x22d   :  { %890 = vpow2.f32 %v362_v59 }
 0x22e   :  { %892 = vpow2.f32 %v364_v60 }
 0x237   :  { %v891_v61 = vpop.eup %890 }
 0x238   :  { %v893_v62 = vpop.eup %892  ;;  %v667_v63 = vadd.f32 -1.0, %v891_v61 }
 0x239   :  { %v668_v0 = vadd.f32 -1.0, %v893_v62 }
 0x23a   :  { %v368_v1 = vmul.f32 1.6732632, %v667_v63 }
 0x23b   :  { %v369_v2 = vmul.f32 1.6732632, %v668_v0 }
 0x23c   :  { %v370_v3 = vsel %vm358_vm3, %v354_v54, %v368_v1 }
 0x23d   :  { %v371_v4 = vsel %vm359_vm4, %v356_v56, %v369_v2  ;;  %v372_v6 = vmul.f32 1.050701, %v370_v3 }
 0x23e   :  { %v373_v5 = vmul.f32 1.050701, %v371_v4  ;;  %v671_v4 = vld [vmem:[%s1210_s8] ss:$0 sm:$0xff] }
 0x240   :  { %514 = vmatprep.mubr.f32.mxu0 %v373_v5 }
 0x241   :  { %515 = vmatmul.mubr.f32.vlgmr.msra.gmra.mrb[2].mxu0 %v372_v6 }
 0x314   :  { %v516_v51 = vpop.f32.mrb[2].mxu0 }
 0x315   :  { %v517_v52 = vadd.f32 %v516_v51, %v443_v49  ;;  %v518_v53 = vpop.f32.mrb[3].mxu0 }
 0x316   :  { %v519_v54 = vadd.f32 %v518_v53, %v447_v50 }
 0x317   :  { %v523_v55 = vmin.f32 %v517_v52, 0.0  ;;  %vm521_vm5 = vcmp.gt.f32.partialorder %v517_v52, 0.0 }
 0x318   :  { %v524_v56 = vmin.f32 %v519_v54, 0.0  ;;  %vm522_vm6 = vcmp.gt.f32.partialorder %v519_v54, 0.0 }
 0x319   :  { %v525_v57 = vmul.f32 1.442695, %v523_v55 }
 0x31a   :  { %v527_v58 = vmul.f32 1.442695, %v524_v56 }
 0x31b   :  { %894 = vpow2.f32 %v525_v57 }
 0x31c   :  { %896 = vpow2.f32 %v527_v58 }
 0x325   :  { %v895_v59 = vpop.eup %894 }
 0x326   :  { %v897_v60 = vpop.eup %896  ;;  %v669_v61 = vadd.f32 -1.0, %v895_v59 }
 0x327   :  { %v670_v62 = vadd.f32 -1.0, %v897_v60 }
 0x328   :  { %v531_v63 = vmul.f32 1.6732632, %v669_v61 }
 0x329   :  { %v532_v0 = vmul.f32 1.6732632, %v670_v62 }
 0x32a   :  { %v533_v41 = vsel %vm521_vm5, %v517_v52, %v531_v63 }
 0x32b   :  { %v534_v43 = vsel %vm522_vm6, %v519_v54, %v532_v0  ;;  %v535_v2 = vmul.f32 1.050701, %v533_v41 }
 0x32c   :  { %v536_v1 = vmul.f32 1.050701, %v534_v43 }
 0x32e   :  { %640 = vmatprep.mubr.f32.mxu1 %v536_v1 }
 0x32f   :  { %641 = vmatmul.mubr.f32.vlgmr.msra.gmra.mrb[2].mxu1 %v535_v2 }
 0x402   :  { %v704_v3 = vpop.f32.mrb[2].mxu1 }
 0x403   :  { %v705_v5 = vpop.f32.mrb[3].mxu1 }
 0x404   :  { %v706_v6 = vadd.f32 %v705_v5, %v704_v3 }
 0x406   :  { %v643_v7 = vadd.f32 %v706_v6, %v671_v4 }
 0x408   :  { %646 = vst [vmem:[#allocation11] sm:$0xff] %v643_v7 }
 0x409   :  { %1019 = shalt.err (!%p1016_p2)
}
 0x40a   :  { %s1020_s15 = scalar_lea.hbm %s1211_s9, 128 }
 0x40b   :  { %p1021_p3 = scmp.ne.s32.totalorder %s1211_s9, %s1020_s15  ;;  %p1024_p4 = scmp.lt.u32.totalorder %s1020_s15, %s1211_s9 }
 0x40d   :  { %p1026_p5 = pnand %p1024_p4, %p1021_p3 }
 0x40f   :  { %1029 = shalt.err (!%p1026_p5)
}
 0x410   :  { %656 = dma.vmem_to_hbm [thread:$0]  %s654_s13, 128, %s1211_s9, [#allocation4]  }
 0x411   :  { %1036 = dma.done.wait [#allocation4], 128  }
 0x412   :  { %1037 = vsyncadd [#allocation4], 4294967168 }
 0x413   :  { %660 = vsyncpa [#allocation3], 1 }
 0x414   :  { %661 = vsyncpa [#allocation6], 1 }
 0x415   :  { %662 = vsyncpa [#allocation9], 1 }
 0x416   :  { %663 = vsyncpa [#allocation4], 1 }

</bundles_post_ra>
